<compile_context>
chip_gen: v7x
topology: tpu7x:2x2x1
jax: 0.10.0
libtpu: 0.0.40
codegen_flags: <defaults>
</compile_context>

<pallas_src>
import jax
import jax.numpy as jnp
from jax.experimental import pallas as pl
from jax.experimental.pallas import tpu as pltpu


def _leaky_relu(x, slope=0.2):
    return jnp.where(x > 0, x, slope * x)


def discriminator_kernel(x_ref, w1_ref, b1_ref, w2_ref, b2_ref, w3_ref, b3_ref,
                         out_ref):
    """One batch-tile of the fused 3-layer MLP.

    x_ref : (TILE_B, D)   bf16  (cast in the wrapper, not in-kernel)
    w1_ref: (D, 512)      bf16, b1_ref: (1, 512) f32
    w2_ref: (512, 256)    bf16, b2_ref: (1, 256) f32
    w3_ref: (256, 128)    bf16  (only column 0 is non-zero)
    b3_ref: (1, 1)        f32 in SMEM (scalar)
    out_ref: (TILE_B, 128) f32 -- lane-dense; column 0 is the logit
    """
    h1 = jnp.dot(x_ref[...], w1_ref[...], preferred_element_type=jnp.float32)
    h1 = _leaky_relu(h1 + b1_ref[...])                                   # (B, 512)
    h2 = jnp.dot(h1.astype(jnp.bfloat16), w2_ref[...],
                 preferred_element_type=jnp.float32)
    h2 = _leaky_relu(h2 + b2_ref[...])                                   # (B, 256)
    out = jnp.dot(h2.astype(jnp.bfloat16), w3_ref[...],
                  preferred_element_type=jnp.float32)                    # (B, 128)
    out_ref[...] = out + b3_ref[0, 0]


def _round_up(x, m):
    return ((x + m - 1) // m) * m


def _choose_tile_b(n):
    """Large batch tiles amortize the ~0.35 us/step pipeline overhead.

    16-row quantum (bf16 sublane packing).  Capped so the grid has at least
    2 steps when the batch allows it, so v7x megacore can shard the
    'parallel' batch axis across both TensorCores.
    """
    tile = min(512, _round_up(n, 16))
    if n >= 32:
        tile = min(tile, _round_up(pl.cdiv(n, 2), 16))
    return max(16, tile)


def discriminator_forward(img, params):
    """img: (N, C, H, W). Returns validity logits (N, 1) float32."""
    w1, b1, w2, b2, w3, b3 = params
    n = img.shape[0]
    # == torch img.view(N, -1); bf16 at the pallas_call boundary halves x DMA.
    x = img.reshape(n, -1).astype(jnp.bfloat16)
    d_in = x.shape[1]

    w1_bf16 = w1.astype(jnp.bfloat16)
    w2_bf16 = w2.astype(jnp.bfloat16)
    # Zero-pad w3 to (256, 128): final projection uses the (otherwise idle) MXU
    # and the output block becomes lane-dense (128 wide).
    w3_pad = jnp.pad(w3.reshape(256, 1), ((0, 0), (0, 127))).astype(jnp.bfloat16)
    b3_scalar = b3.reshape(1, 1).astype(jnp.float32)      # scalar -> SMEM

    tile_b = _choose_tile_b(n)
    grid = (pl.cdiv(n, tile_b),)   # no jnp.pad: edge block is masked by Pallas

    # Explicit VMEM budget: x (2 bufs, bf16) + resident weights (2 bufs, bf16)
    # + biases + out (2 bufs, f32) + h1/h2 intermediates + slack.
    vmem_bytes = (
        2 * tile_b * d_in * 2
        + 2 * (d_in * 512 + 512 * 256 + 256 * 128) * 2
        + 2 * (512 + 256) * 4
        + 2 * tile_b * 128 * 4
        + tile_b * (512 + 256) * 4
    )
    vmem_limit = min(32 * 1024 * 1024, int(vmem_bytes * 1.5) + (2 << 20))

    cost = pl.CostEstimate(
        flops=2 * n * (d_in * 512 + 512 * 256 + 256 * 128),
        transcendentals=0,
        bytes_accessed=(n * d_in * 2 + n * 128 * 4                 # x + out
                        + (d_in * 512 + 512 * 256 + 256 * 128) * 2  # bf16 weights
                        + 512 * 4 + 256 * 4 + 4),                   # biases
    )

    out = pl.pallas_call(
        discriminator_kernel,
        out_shape=jax.ShapeDtypeStruct((n, 128), jnp.float32),
        grid=grid,
        in_specs=[
            pl.BlockSpec((tile_b, d_in), lambda i: (i, 0)),   # x: tiled over batch
            pl.BlockSpec((d_in, 512), lambda i: (0, 0)),      # w1: VMEM-resident
            pl.BlockSpec((1, 512), lambda i: (0, 0)),         # b1: resident
            pl.BlockSpec((512, 256), lambda i: (0, 0)),       # w2: resident
            pl.BlockSpec((1, 256), lambda i: (0, 0)),         # b2: resident
            pl.BlockSpec((256, 128), lambda i: (0, 0)),       # w3 (padded): resident
            pl.BlockSpec(memory_space=pltpu.MemorySpace.SMEM),  # b3 scalar
        ],
        out_specs=pl.BlockSpec((tile_b, 128), lambda i: (i, 0)),
        compiler_params=pltpu.CompilerParams(
            dimension_semantics=("parallel",),
            vmem_limit_bytes=vmem_limit,
        ),
        cost_estimate=cost,
    )(x, w1_bf16, b1, w2_bf16, b2, w3_pad, b3_scalar)

    return out[:, :1]


def init_params(key, d_in):
    """Deterministic synthetic init (PyTorch-Linear-style uniform bounds)."""
    ks = jax.random.split(key, 6)

    def linear(kw, kb, fan_in, fan_out):
        bound = 1.0 / jnp.sqrt(fan_in)
        w = jax.random.uniform(kw, (fan_in, fan_out), jnp.float32, -bound, bound)
        b = jax.random.uniform(kb, (1, fan_out), jnp.float32, -bound, bound)
        return w, b

    w1, b1 = linear(ks[0], ks[1], d_in, 512)
    w2, b2 = linear(ks[2], ks[3], 512, 256)
    w3, b3 = linear(ks[4], ks[5], 256, 1)
    return (w1, b1, w2, b2, w3, b3)


def reference_forward(img, params, simulate_bf16=True):
    """Pure-JAX reference. With simulate_bf16=True it mirrors the kernel's
    bf16-input / f32-accumulate matmuls so the comparison stays tight."""
    w1, b1, w2, b2, w3, b3 = params
    x = img.reshape(img.shape[0], -1).astype(jnp.float32)
    if simulate_bf16:
        cast = lambda a: a.astype(jnp.bfloat16).astype(jnp.float32)
    else:
        cast = lambda a: a
    h1 = _leaky_relu(jnp.dot(cast(x), cast(w1)) + b1)
    h2 = _leaky_relu(jnp.dot(cast(h1), cast(w2)) + b2)
    return jnp.dot(cast(h2), cast(w3)) + b3


if __name__ == "__main__":
    # opt = {'channels': 4, 'img_size': 16}  -> flattened dim 4*16*16 = 1024
    batch, channels, img_size = 2, 4, 16
    key = jax.random.PRNGKey(0)
    k_img, k_par = jax.random.split(key)

    img = jax.random.normal(k_img, (batch, channels, img_size, img_size),
                            dtype=jnp.float32)
    params = init_params(k_par, channels * img_size * img_size)

    out = discriminator_forward(img, params)
    out = jax.block_until_ready(out)

    assert out.shape == (batch, 1)
    # Tight check vs. a bf16-simulated reference (matches kernel numerics).
    ref_bf16 = reference_forward(img, params, simulate_bf16=True)
    assert jnp.allclose(out, ref_bf16, atol=2e-2, rtol=2e-2)
    # Sanity check vs. the pure-f32 PyTorch-equivalent math (bf16 weights /
    # activations only introduce ~1e-2-level differences).
    ref_f32 = reference_forward(img, params, simulate_bf16=False)
    assert jnp.allclose(out, ref_f32, atol=1e-1, rtol=1e-1)
    print("KERNEL_OK")
</pallas_src>

<mosaic_0001>
module attributes {stable_mosaic.version = 11 : i64} {
  func.func @discriminator_kernel(%arg0: i32, %arg1: memref<16x1024xbf16, #tpu.memory_space<vmem>>, %arg2: memref<1024x512xbf16, #tpu.memory_space<vmem>>, %arg3: memref<1x512xf32, #tpu.memory_space<vmem>>, %arg4: memref<512x256xbf16, #tpu.memory_space<vmem>>, %arg5: memref<1x256xf32, #tpu.memory_space<vmem>>, %arg6: memref<256x128xbf16, #tpu.memory_space<vmem>>, %arg7: memref<1x1xf32, #tpu.memory_space<smem>>, %arg8: memref<16x128xf32, #tpu.memory_space<vmem>>) attributes {dimension_semantics = [#tpu.dimension_semantics<parallel>], iteration_bounds = array<i64: 1>, scalar_prefetch = 0 : i64, scratch_operands = 0 : i64, tpu.core_type = #tpu.core_type<tc>, window_params = [{transform_indices = @transform_0, window_bounds = array<i64: 16, 1024>}, {pipeline_mode = #tpu.pipeline_mode<synchronous>, transform_indices = @transform_1, window_bounds = array<i64: 1024, 512>}, {pipeline_mode = #tpu.pipeline_mode<synchronous>, transform_indices = @transform_2, window_bounds = array<i64: 1, 512>}, {pipeline_mode = #tpu.pipeline_mode<synchronous>, transform_indices = @transform_3, window_bounds = array<i64: 512, 256>}, {pipeline_mode = #tpu.pipeline_mode<synchronous>, transform_indices = @transform_4, window_bounds = array<i64: 1, 256>}, {pipeline_mode = #tpu.pipeline_mode<synchronous>, transform_indices = @transform_5, window_bounds = array<i64: 256, 128>}, {transform_indices = @transform_6, window_bounds = array<i64: 1, 1>}, {transform_indices = @transform_7, window_bounds = array<i64: 16, 128>}]} {
    %c0 = arith.constant 0 : index
    %c0_0 = arith.constant 0 : index
    %0 = vector.load %arg1[%c0, %c0_0] : memref<16x1024xbf16, #tpu.memory_space<vmem>>, vector<16x1024xbf16>
    %c0_1 = arith.constant 0 : index
    %c0_2 = arith.constant 0 : index
    %1 = vector.load %arg2[%c0_1, %c0_2] : memref<1024x512xbf16, #tpu.memory_space<vmem>>, vector<1024x512xbf16>
    %cst = arith.constant dense<0.000000e+00> : vector<16x512xf32>
    %2 = tpu.matmul %0, %1, %cst {dimension_numbers = #tpu.dot_dimension_numbers<[1], [0], [0], [1], [0, 0, 1, 1], [], []>} : vector<16x1024xbf16>, vector<1024x512xbf16>, vector<16x512xf32> -> vector<16x512xf32>
    %c0_3 = arith.constant 0 : index
    %c0_4 = arith.constant 0 : index
    %3 = vector.load %arg3[%c0_3, %c0_4] : memref<1x512xf32, #tpu.memory_space<vmem>>, vector<1x512xf32>
    %4 = vector.broadcast %3 : vector<1x512xf32> to vector<16x512xf32>
    %5 = arith.addf %2, %4 : vector<16x512xf32>
    %cst_5 = arith.constant 0.000000e+00 : f32
    %6 = vector.broadcast %cst_5 : f32 to vector<16x512xf32>
    %7 = arith.cmpf ogt, %5, %6 : vector<16x512xf32>
    %cst_6 = arith.constant 2.000000e-01 : f32
    %8 = vector.broadcast %cst_6 : f32 to vector<16x512xf32>
    %9 = arith.mulf %8, %5 : vector<16x512xf32>
    %10 = arith.select %7, %5, %9 : vector<16x512xi1>, vector<16x512xf32>
    %11 = arith.truncf %10 : vector<16x512xf32> to vector<16x512xbf16>
    %c0_7 = arith.constant 0 : index
    %c0_8 = arith.constant 0 : index
    %12 = vector.load %arg4[%c0_7, %c0_8] : memref<512x256xbf16, #tpu.memory_space<vmem>>, vector<512x256xbf16>
    %cst_9 = arith.constant dense<0.000000e+00> : vector<16x256xf32>
    %13 = tpu.matmul %11, %12, %cst_9 {dimension_numbers = #tpu.dot_dimension_numbers<[1], [0], [0], [1], [0, 0, 1, 1], [], []>} : vector<16x512xbf16>, vector<512x256xbf16>, vector<16x256xf32> -> vector<16x256xf32>
    %c0_10 = arith.constant 0 : index
    %c0_11 = arith.constant 0 : index
    %14 = vector.load %arg5[%c0_10, %c0_11] : memref<1x256xf32, #tpu.memory_space<vmem>>, vector<1x256xf32>
    %15 = vector.broadcast %14 : vector<1x256xf32> to vector<16x256xf32>
    %16 = arith.addf %13, %15 : vector<16x256xf32>
    %cst_12 = arith.constant 0.000000e+00 : f32
    %17 = vector.broadcast %cst_12 : f32 to vector<16x256xf32>
    %18 = arith.cmpf ogt, %16, %17 : vector<16x256xf32>
    %cst_13 = arith.constant 2.000000e-01 : f32
    %19 = vector.broadcast %cst_13 : f32 to vector<16x256xf32>
    %20 = arith.mulf %19, %16 : vector<16x256xf32>
    %21 = arith.select %18, %16, %20 : vector<16x256xi1>, vector<16x256xf32>
    %22 = arith.truncf %21 : vector<16x256xf32> to vector<16x256xbf16>
    %c0_14 = arith.constant 0 : index
    %c0_15 = arith.constant 0 : index
    %23 = vector.load %arg6[%c0_14, %c0_15] : memref<256x128xbf16, #tpu.memory_space<vmem>>, vector<256x128xbf16>
    %cst_16 = arith.constant dense<0.000000e+00> : vector<16x128xf32>
    %24 = tpu.matmul %22, %23, %cst_16 {dimension_numbers = #tpu.dot_dimension_numbers<[1], [0], [0], [1], [0, 0, 1, 1], [], []>} : vector<16x256xbf16>, vector<256x128xbf16>, vector<16x128xf32> -> vector<16x128xf32>
    %c0_17 = arith.constant 0 : index
    %c0_18 = arith.constant 0 : index
    %25 = memref.load %arg7[%c0_17, %c0_18] : memref<1x1xf32, #tpu.memory_space<smem>>
    %26 = vector.broadcast %25 : f32 to vector<16x128xf32>
    %27 = arith.addf %24, %26 : vector<16x128xf32>
    %c0_19 = arith.constant 0 : index
    %c0_20 = arith.constant 0 : index
    %28 = vector.load %arg8[%c0_19, %c0_20] : memref<16x128xf32, #tpu.memory_space<vmem>>, vector<16x128xf32>
    tpu.vector_store %arg8[%c0_19, %c0_20], %27 {strides = array<i32>} : memref<16x128xf32, #tpu.memory_space<vmem>>, vector<16x128xf32>,
    return
  }
  func.func @transform_0(%arg0: i32) -> (i32, i32) {
    %c0_i32 = arith.constant 0 : i32
    %c0_i32_0 = arith.constant 0 : i32
    return %arg0, %c0_i32 : i32, i32
  }
  func.func @transform_1(%arg0: i32) -> (i32, i32) {
    %c0_i32 = arith.constant 0 : i32
    %c0_i32_0 = arith.constant 0 : i32
    %c0_i32_1 = arith.constant 0 : i32
    return %c0_i32, %c0_i32_0 : i32, i32
  }
  func.func @transform_2(%arg0: i32) -> (i32, i32) {
    %c0_i32 = arith.constant 0 : i32
    %c0_i32_0 = arith.constant 0 : i32
    %c0_i32_1 = arith.constant 0 : i32
    return %c0_i32, %c0_i32_0 : i32, i32
  }
  func.func @transform_3(%arg0: i32) -> (i32, i32) {
    %c0_i32 = arith.constant 0 : i32
    %c0_i32_0 = arith.constant 0 : i32
    %c0_i32_1 = arith.constant 0 : i32
    return %c0_i32, %c0_i32_0 : i32, i32
  }
  func.func @transform_4(%arg0: i32) -> (i32, i32) {
    %c0_i32 = arith.constant 0 : i32
    %c0_i32_0 = arith.constant 0 : i32
    %c0_i32_1 = arith.constant 0 : i32
    return %c0_i32, %c0_i32_0 : i32, i32
  }
  func.func @transform_5(%arg0: i32) -> (i32, i32) {
    %c0_i32 = arith.constant 0 : i32
    %c0_i32_0 = arith.constant 0 : i32
    %c0_i32_1 = arith.constant 0 : i32
    return %c0_i32, %c0_i32_0 : i32, i32
  }
  func.func @transform_6(%arg0: i32) -> (i32, i32) {
    %c0_i32 = arith.constant 0 : i32
    %c0_i32_0 = arith.constant 0 : i32
    %c0_i32_1 = arith.constant 0 : i32
    return %c0_i32, %c0_i32_0 : i32, i32
  }
  func.func @transform_7(%arg0: i32) -> (i32, i32) {
    %c0_i32 = arith.constant 0 : i32
    %c0_i32_0 = arith.constant 0 : i32
    return %arg0, %c0_i32 : i32, i32
  }
}

</mosaic_0001>

<bundles_post_ra>
// kernel: tpu_custom_call.1
= control target key start
LH: loop header
LB: loop body
LE: loop exit
PB: predicated region body
PF: predicated region fallthrough
CT: control target
= control target key end

     0   :  { %13 = vsyncpa [#allocation4], 0  ;;  %s4105_s0 = inlined_call_operand.hbm [shape: bf16[2,1024], index: 0, kind: input, shape index: {}]   ;;  %s4106_s1 = inlined_call_operand.hbm [shape: bf16[1024,512], index: 1, kind: input, shape index: {}]   ;;  %s4107_s2 = inlined_call_operand.vmem [shape: f32[1,512], index: 2, kind: input, shape index: {}]   ;;  %s4108_s3 = inlined_call_operand.hbm [shape: bf16[512,256], index: 3, kind: input, shape index: {}]   ;;  %s4109_s4 = inlined_call_operand.vmem [shape: f32[1,256], index: 4, kind: input, shape index: {}]   ;;  %s4110_s5 = inlined_call_operand.hbm [shape: bf16[256,128], index: 5, kind: input, shape index: {}]   ;;  %s4111_s6 = inlined_call_operand.<no memory space> [shape: f32[1,1], index: 6, kind: input, shape index: {}]   ;;  %s4112_s7 = inlined_call_operand.hbm [shape: f32[2,128], index: 7, kind: output, shape index: {}]  }
   0x1   :  { %14 = vsyncpa [#allocation7], 0 }
   0x2   :  { %15 = vsyncpa [#allocation10], 0 }
   0x3   :  { %16 = vsyncpa [#allocation5], 0 }
   0x4   :  { %21 = vsyncadd [#allocation4], 896  ;;  %s3900_s24 = smov [#allocation6]   ;;  %s3782_s28 = scalar_lea.hbm %s4106_s1, 32768 }
   0x5   :  { %s34_s25 = sshll.u32 %s3900_s24, 4  ;;  %p3783_p0 = scmp.ne.s32.totalorder %s4106_s1, %s3782_s28  ;;  %s35_s25 = int_to_ptr.vmem [resolvable:$true] %s34_s25 }
   0x6   :  { %p3786_p1 = scmp.lt.u32.totalorder %s3782_s28, %s4106_s1 }
   0x8   :  { %p3788_p2 = pnand %p3786_p1, %p3783_p0 }
   0xa   :  { %3791 = shalt.err (!%p3788_p2)
}
   0xb   :  { %s3792_s10 = scalar_lea.vmem %s35_s25, 32768  ;;  %p3797_p4 = scmp.lt.s32.totalorder %s35_s25, %s35_s25 }
   0xc   :  { %p3793_p3 = scmp.ne.s32.totalorder %s35_s25, %s3792_s10  ;;  %p3798_p5 = scmp.lt.s32.totalorder %s3792_s10, %s3792_s10 }
   0xe   :  { %p3799_p6 = por %p3798_p5, %p3797_p4 }
  0x10   :  { %p3800_p7 = pnand %p3799_p6, %p3793_p3 }
  0x12   :  { %3803 = shalt.err (!%p3800_p7)
}
  0x13   :  { %s3901_s11 = smov 256   ;;  %s3902_s12 = smov 16  }
  0x14   :  { %40 = dma.hbm_to_vmem [thread:$0]  %s4106_s1, 32768, %s35_s25, [#allocation7], %s3901_s11, %s3901_s11, %s3902_s12  }
  0x15   :  { %s3903_s15 = smov [#allocation3]   ;;  %s3804_s19 = scalar_lea.hbm %s4105_s0, 128 }
  0x16   :  { %s22_s16 = sshll.u32 %s3903_s15, 4  ;;  %p3805_p8 = scmp.ne.s32.totalorder %s4105_s0, %s3804_s19  ;;  %s23_s16 = int_to_ptr.vmem [resolvable:$true] %s22_s16 }
  0x17   :  { %p3808_p9 = scmp.lt.u32.totalorder %s3804_s19, %s4105_s0 }
  0x19   :  { %p3810_p10 = pnand %p3808_p9, %p3805_p8 }
  0x1b   :  { %3813 = shalt.err (!%p3810_p10)
}
  0x1c   :  { %s3814_s24 = scalar_lea.vmem %s23_s16, 128  ;;  %s3818_s1 = scalar_lea.vmem %s23_s16, 1024 }
  0x1d   :  { %p3815_p11 = scmp.ne.s32.totalorder %s23_s16, %s3814_s24  ;;  %p3819_p12 = scmp.lt.s32.totalorder %s23_s16, %s23_s16 }
  0x1e   :  { %p3820_p13 = scmp.lt.s32.totalorder %s3818_s1, %s3814_s24 }
  0x20   :  { %p3821_p0 = por %p3820_p13, %p3819_p12 }
  0x22   :  { %p3822_p1 = pnand %p3821_p0, %p3815_p11 }
  0x24   :  { %3825 = shalt.err (!%p3822_p1)
}
  0x25   :  { %s3904_s25 = smov 128   ;;  %s3905_s26 = smov 8  }
  0x26   :  { %28 = dma.hbm_to_vmem [thread:$0]  %s4105_s0, 128, %s23_s16, [#allocation4], %s3904_s25, %s3904_s25, %s3905_s26  }
  0x27   :  { %s3906_s29 = smov [#allocation8]   ;;  %s3907_s8 = smov [#allocation9]  }
  0x28   :  { %s48_s30 = sshll.u32 %s3906_s29, 4  ;;  %s62_s9 = sshll.u32 %s3907_s8, 4  ;;  %s49_s30 = int_to_ptr.vmem [resolvable:$true] %s48_s30  ;;  %s3978_s9 = int_to_ptr.vmem [resolvable:$true] %s62_s9 }
  0x29   :  { %s3826_s12 = scalar_lea.hbm %s4108_s3, 8192 }
  0x2a   :  { %p3827_p2 = scmp.ne.s32.totalorder %s4108_s3, %s3826_s12  ;;  %p3830_p3 = scmp.lt.u32.totalorder %s3826_s12, %s4108_s3 }
  0x2c   :  { %p3832_p4 = pnand %p3830_p3, %p3827_p2 }
  0x2e   :  { %3835 = shalt.err (!%p3832_p4)
}
  0x2f   :  { %s3836_s0 = scalar_lea.vmem %s49_s30, 8192  ;;  %p3841_p6 = scmp.lt.s32.totalorder %s49_s30, %s49_s30 }
  0x30   :  { %p3837_p5 = scmp.ne.s32.totalorder %s49_s30, %s3836_s0  ;;  %p3842_p7 = scmp.lt.s32.totalorder %s3836_s0, %s3836_s0 }
  0x32   :  { %p3843_p8 = por %p3842_p7, %p3841_p6 }
  0x34   :  { %p3844_p9 = pnand %p3843_p8, %p3837_p5 }
  0x36   :  { %3847 = shalt.err (!%p3844_p9)
}
  0x37   :  { %54 = dma.hbm_to_vmem [thread:$0]  %s4108_s3, 8192, %s49_s30, [#allocation7], %s3904_s25, %s3904_s25, %s3905_s26  }
  0x38   :  { %s3848_s21 = scalar_lea.hbm %s4110_s5, 2048 }
  0x39   :  { %p3849_p10 = scmp.ne.s32.totalorder %s4110_s5, %s3848_s21  ;;  %p3852_p11 = scmp.lt.u32.totalorder %s3848_s21, %s4110_s5 }
  0x3b   :  { %p3854_p12 = pnand %p3852_p11, %p3849_p10 }
  0x3d   :  { %3857 = shalt.err (!%p3854_p12)
}
  0x3e   :  { %s3858_s27 = scalar_lea.vmem %s3978_s9, 2048  ;;  %p3863_p0 = scmp.lt.s32.totalorder %s3978_s9, %s3978_s9 }
  0x3f   :  { %p3859_p13 = scmp.ne.s32.totalorder %s3978_s9, %s3858_s27  ;;  %p3864_p1 = scmp.lt.s32.totalorder %s3858_s27, %s3858_s27 }
  0x41   :  { %p3865_p2 = por %p3864_p1, %p3863_p0 }
  0x43   :  { %p3866_p3 = pnand %p3865_p2, %p3859_p13 }
  0x45   :  { %3869 = shalt.err (!%p3866_p3)
}
  0x46   :  { %s3908_s3 = smov 64   ;;  %s3909_s25 = smov 4  }
  0x47   :  { %68 = dma.hbm_to_vmem [thread:$0]  %s4110_s5, 2048, %s3978_s9, [#allocation10], %s3908_s3, %s3908_s3, %s3909_s25  }
  0x48   :  { %3892 = dma.done.wait [#allocation4], 1024  }
  0x49   :  { %3893 = vsyncadd [#allocation4], 4294966272 }
  0x4a   :  { %3894 = dma.done.wait [#allocation7], 40960  }
  0x4b   :  { %3895 = vsyncadd [#allocation7], 4294926336 }
  0x4c   :  { %3896 = dma.done.wait [#allocation10], 2048  }
  0x4d   :  { %3897 = vsyncadd [#allocation10], 4294965248  ;;  %v3274_v0 = vld [vmem:[#allocation6 + $0x4] ss:$16 sps:$4 sm:$0xff]   ;;  %v3278_v2 = vld [vmem:[#allocation6] ss:$16 sps:$4 sm:$0xff]   ;;  %v350_v39 = vlaneseq }
  0x4e   :  { %v3276_v1 = vld [vmem:[#allocation6 + $0x204] ss:$16 sps:$4 sm:$0xff]   ;;  %1802 = vmatprep.subr.bf16.mxu1 %v3274_v0  ;;  %v3279_v3 = vld [vmem:[#allocation6 + $0x200] ss:$16 sps:$4 sm:$0xff]   ;;  %v3910_v40 = vmov 1966171168  }
  0x4f   :  { %1845 = vmatprep.subr.bf16.mxu0 %v3276_v1  ;;  %v3280_v4 = vld [vmem:[#allocation6 + $0x24] ss:$16 sps:$4 sm:$0xff]   ;;  %1803 = vmatpush1.bf16.msra.mxu1 %v3278_v2  ;;  %v3284_v6 = vld [vmem:[#allocation6 + $0x20] ss:$16 sps:$4 sm:$0xff]   ;;  %v387_v41 = vunpack.c.l.s4 %v3910_v40  ;;  %v4009_v47 = vshrl.u32 %v350_v39, 7 }
  0x50   :  { %1846 = vmatpush1.bf16.msra.mxu0 %v3279_v3  ;;  %v3282_v5 = vld [vmem:[#allocation6 + $0x224] ss:$16 sps:$4 sm:$0xff]   ;;  %1804 = vmatprep.subr.bf16.mxu1 %v3280_v4  ;;  %v3285_v7 = vld [vmem:[#allocation6 + $0x220] ss:$16 sps:$4 sm:$0xff]  }
  0x51   :  { %1847 = vmatprep.subr.bf16.mxu0 %v3282_v5  ;;  %v3286_v8 = vld [vmem:[#allocation6 + $0x44] ss:$16 sps:$4 sm:$0xff]   ;;  %v3290_v10 = vld [vmem:[#allocation6 + $0x40] ss:$16 sps:$4 sm:$0xff]   ;;  %v388_v48 = vunpack.c.0.s8 %v387_v41 }
  0x52   :  { %v3288_v9 = vld [vmem:[#allocation6 + $0x244] ss:$16 sps:$4 sm:$0xff]   ;;  %v3291_v11 = vld [vmem:[#allocation6 + $0x240] ss:$16 sps:$4 sm:$0xff]  }
  0x53   :  { %1805 = vmatpush1.bf16.msra.mxu1 %v3284_v6  ;;  %v3292_v12 = vld [vmem:[#allocation6 + $0x64] ss:$16 sps:$4 sm:$0xff]   ;;  %v3296_v14 = vld [vmem:[#allocation6 + $0x60] ss:$16 sps:$4 sm:$0xff]   ;;  %v4012_v54 = vsub.s32 %v388_v48, %v4009_v47 }
  0x54   :  { %1848 = vmatpush1.bf16.msra.mxu0 %v3285_v7  ;;  %1806 = vmatprep.subr.bf16.mxu1 %v3286_v8  ;;  %v3294_v13 = vld [vmem:[#allocation6 + $0x264] ss:$16 sps:$4 sm:$0xff]   ;;  %v3297_v15 = vld [vmem:[#allocation6 + $0x260] ss:$16 sps:$4 sm:$0xff]  }
  0x55   :  { %1849 = vmatprep.subr.bf16.mxu0 %v3288_v9  ;;  %v3298_v16 = vld [vmem:[#allocation6 + $0x84] ss:$16 sps:$4 sm:$0xff]   ;;  %v3302_v18 = vld [vmem:[#allocation6 + $0x80] ss:$16 sps:$4 sm:$0xff]  }
  0x56   :  { %v3300_v17 = vld [vmem:[#allocation6 + $0x284] ss:$16 sps:$4 sm:$0xff]   ;;  %v3303_v19 = vld [vmem:[#allocation6 + $0x280] ss:$16 sps:$4 sm:$0xff]  }
  0x57   :  { %1807 = vmatpush1.bf16.msra.mxu1 %v3290_v10  ;;  %v3304_v20 = vld [vmem:[#allocation6 + $0xa4] ss:$16 sps:$4 sm:$0xff]   ;;  %v3308_v22 = vld [vmem:[#allocation6 + $0xa0] ss:$16 sps:$4 sm:$0xff]  }
  0x58   :  { %1850 = vmatpush1.bf16.msra.mxu0 %v3291_v11  ;;  %1808 = vmatprep.subr.bf16.mxu1 %v3292_v12  ;;  %v3306_v21 = vld [vmem:[#allocation6 + $0x2a4] ss:$16 sps:$4 sm:$0xff]   ;;  %v3309_v23 = vld [vmem:[#allocation6 + $0x2a0] ss:$16 sps:$4 sm:$0xff]  }
  0x59   :  { %1851 = vmatprep.subr.bf16.mxu0 %v3294_v13  ;;  %v3310_v24 = vld [vmem:[#allocation6 + $0xc4] ss:$16 sps:$4 sm:$0xff]   ;;  %v3314_v26 = vld [vmem:[#allocation6 + $0xc0] ss:$16 sps:$4 sm:$0xff]  }
  0x5a   :  { %v3312_v25 = vld [vmem:[#allocation6 + $0x2c4] ss:$16 sps:$4 sm:$0xff]   ;;  %v3315_v27 = vld [vmem:[#allocation6 + $0x2c0] ss:$16 sps:$4 sm:$0xff]  }
  0x5b   :  { %1809 = vmatpush1.bf16.msra.mxu1 %v3296_v14  ;;  %v3316_v28 = vld [vmem:[#allocation6 + $0xe4] ss:$16 sps:$4 sm:$0xff]   ;;  %v3320_v30 = vld [vmem:[#allocation6 + $0xe0] ss:$16 sps:$4 sm:$0xff]  }
  0x5c   :  { %1852 = vmatpush1.bf16.msra.mxu0 %v3297_v15  ;;  %1810 = vmatprep.subr.bf16.mxu1 %v3298_v16  ;;  %v3318_v29 = vld [vmem:[#allocation6 + $0x2e4] ss:$16 sps:$4 sm:$0xff]   ;;  %v3321_v31 = vld [vmem:[#allocation6 + $0x2e0] ss:$16 sps:$4 sm:$0xff]  }
  0x5d   :  { %1853 = vmatprep.subr.bf16.mxu0 %v3300_v17  ;;  %v3322_v32 = vld [vmem:[#allocation6 + $0x104] ss:$16 sps:$4 sm:$0xff]   ;;  %v3326_v34 = vld [vmem:[#allocation6 + $0x100] ss:$16 sps:$4 sm:$0xff]  }
  0x5e   :  { %v3324_v33 = vld [vmem:[#allocation6 + $0x304] ss:$16 sps:$4 sm:$0xff]   ;;  %v3327_v35 = vld [vmem:[#allocation6 + $0x300] ss:$16 sps:$4 sm:$0xff]  }
  0x5f   :  { %1811 = vmatpush1.bf16.msra.mxu1 %v3302_v18  ;;  %v3328_v36 = vld [vmem:[#allocation6 + $0x124] ss:$16 sps:$4 sm:$0xff]   ;;  %v3332_v38 = vld [vmem:[#allocation6 + $0x120] ss:$16 sps:$4 sm:$0xff]  }
  0x60   :  { %1854 = vmatpush1.bf16.msra.mxu0 %v3303_v19  ;;  %1812 = vmatprep.subr.bf16.mxu1 %v3304_v20  ;;  %v3330_v37 = vld [vmem:[#allocation6 + $0x324] ss:$16 sps:$4 sm:$0xff]   ;;  %v3333_v42 = vld [vmem:[#allocation6 + $0x320] ss:$16 sps:$4 sm:$0xff]  }
  0x61   :  { %1855 = vmatprep.subr.bf16.mxu0 %v3306_v21  ;;  %v3334_v43 = vld [vmem:[#allocation6 + $0x144] ss:$16 sps:$4 sm:$0xff]   ;;  %v3338_v45 = vld [vmem:[#allocation6 + $0x140] ss:$16 sps:$4 sm:$0xff]  }
  0x62   :  { %v3336_v44 = vld [vmem:[#allocation6 + $0x344] ss:$16 sps:$4 sm:$0xff]   ;;  %v3339_v46 = vld [vmem:[#allocation6 + $0x340] ss:$16 sps:$4 sm:$0xff]  }
  0x63   :  { %1813 = vmatpush1.bf16.msra.mxu1 %v3308_v22  ;;  %v3340_v49 = vld [vmem:[#allocation6 + $0x164] ss:$16 sps:$4 sm:$0xff]   ;;  %v3344_v51 = vld [vmem:[#allocation6 + $0x160] ss:$16 sps:$4 sm:$0xff]  }
  0x64   :  { %1856 = vmatpush1.bf16.msra.mxu0 %v3309_v23  ;;  %1814 = vmatprep.subr.bf16.mxu1 %v3310_v24  ;;  %v3342_v50 = vld [vmem:[#allocation6 + $0x364] ss:$16 sps:$4 sm:$0xff]   ;;  %v3345_v52 = vld [vmem:[#allocation6 + $0x360] ss:$16 sps:$4 sm:$0xff]  }
  0x65   :  { %1857 = vmatprep.subr.bf16.mxu0 %v3312_v25  ;;  %v3346_v53 = vld [vmem:[#allocation6 + $0x184] ss:$16 sps:$4 sm:$0xff]   ;;  %v3370_v56 = vld [vmem:[#allocation3] ss:$8 sps:$4 sm:$0xff]   ;;  %v3373_v59 = vld [vmem:[#allocation3 + $0x10] ss:$8 sps:$4 sm:$0xff]  }
  0x66   :  { %v3348_v55 = vld [vmem:[#allocation6 + $0x384] ss:$16 sps:$4 sm:$0xff]   ;;  %v3350_v57 = vld [vmem:[#allocation6 + $0x180] ss:$16 sps:$4 sm:$0xff]   ;;  %v392_v0 = vrot.slane %v3370_v56, %v4012_v54  ;;  %v406_v2 = vrot.slane %v3373_v59, %v4012_v54  ;;  %v3405_v59 = vld [vmem:[#allocation6 + $0x6c] ss:$16 sps:$4 sm:$0xff]  }
  0x67   :  { %1815 = vmatpush1.bf16.msra.mxu1 %v3314_v26  ;;  %v3351_v58 = vld [vmem:[#allocation6 + $0x380] ss:$16 sps:$4 sm:$0xff]   ;;  %v3352_v61 = vld [vmem:[#allocation6 + $0x1a4] ss:$16 sps:$4 sm:$0xff]  }
  0x68   :  { %1858 = vmatpush1.bf16.msra.mxu0 %v3315_v27  ;;  %1816 = vmatprep.subr.bf16.mxu1 %v3316_v28  ;;  %v3376_v60 = vld [vmem:[#allocation3 + $0x20] ss:$8 sps:$4 sm:$0xff]   ;;  %v3354_v62 = vld [vmem:[#allocation6 + $0x3a4] ss:$16 sps:$4 sm:$0xff]   ;;  %v3379_v63 = vld [vmem:[#allocation3 + $0x30] ss:$8 sps:$4 sm:$0xff]   ;;  %v443_v8 = vcombine.high %v392_v0, %v406_v2  ;;  %v442_v23 = vcombine.low %v392_v0, %v406_v2 }
  0x69   :  { %1859 = vmatprep.subr.bf16.mxu0 %v3318_v29  ;;  %v3372_v1 = vld [vmem:[#allocation3 + $0x4] ss:$8 sps:$4 sm:$0xff]   ;;  %v420_v3 = vrot.slane %v3376_v60, %v4012_v54  ;;  %v3375_v4 = vld [vmem:[#allocation3 + $0x14] ss:$8 sps:$4 sm:$0xff]   ;;  %v434_v5 = vrot.slane %v3379_v63, %v4012_v54  ;;  %v3356_v9 = vld [vmem:[#allocation6 + $0x1a0] ss:$16 sps:$4 sm:$0xff]  }
  0x6a   :  { %v3378_v6 = vld [vmem:[#allocation3 + $0x24] ss:$8 sps:$4 sm:$0xff]   ;;  %v3381_v7 = vld [vmem:[#allocation3 + $0x34] ss:$8 sps:$4 sm:$0xff]   ;;  %v3357_v10 = vld [vmem:[#allocation6 + $0x3a0] ss:$16 sps:$4 sm:$0xff]   ;;  %v470_v13 = vrot.slane %v443_v8, %v4012_v54  ;;  %v399_v16 = vrot.slane %v3372_v1, %v4012_v54  ;;  %v413_v17 = vrot.slane %v3375_v4, %v4012_v54 }
  0x6b   :  { %1817 = vmatpush1.bf16.msra.mxu1 %v3320_v30  ;;  %v447_v11 = vcombine.high %v420_v3, %v434_v5  ;;  %v3358_v12 = vld [vmem:[#allocation6 + $0x1c4] ss:$16 sps:$4 sm:$0xff]   ;;  %v427_v18 = vrot.slane %v3378_v6, %v4012_v54  ;;  %v441_v19 = vrot.slane %v3381_v7, %v4012_v54  ;;  %v3362_v20 = vld [vmem:[#allocation6 + $0x1c0] ss:$16 sps:$4 sm:$0xff]   ;;  %v446_v24 = vcombine.low %v420_v3, %v434_v5  ;;  %v3411_v63 = vld [vmem:[#allocation6 + $0x8c] ss:$16 sps:$4 sm:$0xff]  }
  0x6c   :  { %1860 = vmatpush1.bf16.msra.mxu0 %v3321_v31  ;;  %1818 = vmatprep.subr.bf16.mxu1 %v3322_v32  ;;  %v3360_v14 = vld [vmem:[#allocation6 + $0x3c4] ss:$16 sps:$4 sm:$0xff]   ;;  %v3363_v21 = vld [vmem:[#allocation6 + $0x3c0] ss:$16 sps:$4 sm:$0xff]   ;;  %v445_v28 = vcombine.high %v399_v16, %v413_v17  ;;  %v444_v30 = vcombine.low %v399_v16, %v413_v17  ;;  %v3409_v1 = vld [vmem:[#allocation6 + $0x88] ss:$16 sps:$4 sm:$0xff]  }
  0x6d   :  { %1861 = vmatprep.subr.bf16.mxu0 %v3324_v33  ;;  %v498_v15 = vrot.slane %v447_v11, %v4012_v54  ;;  %v3364_v26 = vld [vmem:[#allocation6 + $0x1e4] ss:$16 sps:$4 sm:$0xff]   ;;  %v449_v29 = vcombine.high %v427_v18, %v441_v19  ;;  %v448_v31 = vcombine.low %v427_v18, %v441_v19  ;;  %v3368_v32 = vld [vmem:[#allocation6 + $0x1e0] ss:$16 sps:$4 sm:$0xff]   ;;  %v3417_v3 = vld [vmem:[#allocation6 + $0xac] ss:$16 sps:$4 sm:$0xff]  }
  0x6e   :  { %v3366_v27 = vld [vmem:[#allocation6 + $0x3e4] ss:$16 sps:$4 sm:$0xff]   ;;  %v3369_v33 = vld [vmem:[#allocation6 + $0x3e0] ss:$16 sps:$4 sm:$0xff]   ;;  %v4032_v40 = vrot.slane %v444_v30, %v4012_v54  ;;  %v3415_v5 = vld [vmem:[#allocation6 + $0xa8] ss:$16 sps:$4 sm:$0xff]  }
  0x6f   :  { %1819 = vmatpush1.bf16.msra.mxu1 %v3326_v34  ;;  %v510_v22 = vcombine.low %v470_v13, %v498_v15  ;;  %v4024_v25 = vcombine.high %v470_v13, %v498_v15  ;;  %v456_v34 = vrot.slane %v442_v23, %v4012_v54  ;;  %v505_v39 = vrot.slane %v449_v29, %v4012_v54  ;;  %v3394_v56 = vld [vmem:[#allocation6 + $0x440] ss:$16 sps:$4 sm:$0xff]   ;;  %v3414_v2 = vld [vmem:[#allocation6 + $0x4a4] ss:$16 sps:$4 sm:$0xff]   ;;  %v3423_v7 = vld [vmem:[#allocation6 + $0xcc] ss:$16 sps:$4 sm:$0xff]  }
  0x70   :  { %1862 = vmatpush1.bf16.msra.mxu0 %v3327_v35  ;;  %1820 = vmatprep.subr.bf16.mxu1 %v3328_v36  ;;  %v484_v35 = vrot.slane %v446_v24, %v4012_v54  ;;  %v3384_v36 = vld [vmem:[#allocation6 + $0x404] ss:$16 sps:$4 sm:$0xff]   ;;  %v4035_v41 = vrot.slane %v448_v31, %v4012_v54  ;;  %v3400_v60 = vld [vmem:[#allocation6 + $0x460] ss:$16 sps:$4 sm:$0xff]   ;;  %v3429_v11 = vld [vmem:[#allocation6 + $0xec] ss:$16 sps:$4 sm:$0xff]  }
  0x71   :  { %1863 = vmatprep.subr.bf16.mxu0 %v3330_v37  ;;  %1834 = vmatprep.mubr.bf16.mxu1 %v510_v22  ;;  %v3387_v37 = vld [vmem:[#allocation6 + $0xc] ss:$16 sps:$4 sm:$0xff]   ;;  %v3406_v0 = vld [vmem:[#allocation6 + $0x480] ss:$16 sps:$4 sm:$0xff]   ;;  %v3420_v6 = vld [vmem:[#allocation6 + $0x4c4] ss:$16 sps:$4 sm:$0xff]  }
  0x72   :  { %1877 = vmatprep.mubr.bf16.mxu0 %v4024_v25  ;;  %v3412_v4 = vld [vmem:[#allocation6 + $0x4a0] ss:$16 sps:$4 sm:$0xff]   ;;  %v3427_v13 = vld [vmem:[#allocation6 + $0xe8] ss:$16 sps:$4 sm:$0xff]   ;;  %v3435_v15 = vld [vmem:[#allocation6 + $0x10c] ss:$16 sps:$4 sm:$0xff]  }
  0x73   :  { %1821 = vmatpush1.bf16.msra.mxu1 %v3332_v38  ;;  %v477_v38 = vrot.slane %v445_v28, %v4012_v54  ;;  %v3396_v54 = vld [vmem:[#allocation6 + $0x444] ss:$16 sps:$4 sm:$0xff]   ;;  %v3418_v8 = vld [vmem:[#allocation6 + $0x4c0] ss:$16 sps:$4 sm:$0xff]   ;;  %v3433_v17 = vld [vmem:[#allocation6 + $0x108] ss:$16 sps:$4 sm:$0xff]  }
  0x74   :  { %1864 = vmatpush1.bf16.msra.mxu0 %v3333_v42  ;;  %1822 = vmatprep.subr.bf16.mxu1 %v3334_v43  ;;  %v4037_v42 = vcombine.low %v456_v34, %v484_v35  ;;  %v3382_v43 = vld [vmem:[#allocation6 + $0x400] ss:$16 sps:$4 sm:$0xff]   ;;  %v3438_v18 = vld [vmem:[#allocation6 + $0x524] ss:$16 sps:$4 sm:$0xff]   ;;  %v3441_v19 = vld [vmem:[#allocation6 + $0x12c] ss:$16 sps:$4 sm:$0xff]  }
  0x75   :  { %1865 = vmatprep.subr.bf16.mxu0 %v3336_v44  ;;  %v3385_v44 = vld [vmem:[#allocation6 + $0x8] ss:$16 sps:$4 sm:$0xff]   ;;  %v4041_v48 = vcombine.high %v477_v38, %v505_v39  ;;  %v3430_v16 = vld [vmem:[#allocation6 + $0x500] ss:$16 sps:$4 sm:$0xff]   ;;  %v3447_v23 = vld [vmem:[#allocation6 + $0x14c] ss:$16 sps:$4 sm:$0xff]  }
  0x76   :  { %v3442_v24 = vld [vmem:[#allocation6 + $0x540] ss:$16 sps:$4 sm:$0xff]   ;;  %v3453_v28 = vld [vmem:[#allocation6 + $0x16c] ss:$16 sps:$4 sm:$0xff]   ;;  %v3451_v30 = vld [vmem:[#allocation6 + $0x168] ss:$16 sps:$4 sm:$0xff]  }
  0x77   :  { %1823 = vmatpush1.bf16.msra.mxu1 %v3338_v45  ;;  %v4039_v45 = vcombine.high %v456_v34, %v484_v35  ;;  %v3448_v29 = vld [vmem:[#allocation6 + $0x560] ss:$16 sps:$4 sm:$0xff]   ;;  %v3456_v31 = vld [vmem:[#allocation6 + $0x584] ss:$16 sps:$4 sm:$0xff]   ;;  %v3457_v34 = vld [vmem:[#allocation6 + $0x188] ss:$16 sps:$4 sm:$0xff]  }
  0x78   :  { %1866 = vmatpush1.bf16.msra.mxu0 %v3339_v46  ;;  %1824 = vmatprep.subr.bf16.mxu1 %v3340_v49  ;;  %v3390_v46 = vld [vmem:[#allocation6 + $0x424] ss:$16 sps:$4 sm:$0xff]   ;;  %v4045_v49 = vcombine.high %v4032_v40, %v4035_v41 }
  0x79   :  { %1867 = vmatprep.subr.bf16.mxu0 %v3342_v50  ;;  %v3393_v50 = vld [vmem:[#allocation6 + $0x2c] ss:$16 sps:$4 sm:$0xff]   ;;  %v3462_v35 = vld [vmem:[#allocation6 + $0x5a4] ss:$16 sps:$4 sm:$0xff]  }
  0x7b   :  { %1825 = vmatpush1.bf16.msra.mxu1 %v3344_v51  ;;  %v4047_v51 = vcombine.low %v477_v38, %v505_v39  ;;  %v3463_v38 = vld [vmem:[#allocation6 + $0x1a8] ss:$16 sps:$4 sm:$0xff]   ;;  %v3468_v39 = vld [vmem:[#allocation6 + $0x5c4] ss:$16 sps:$4 sm:$0xff]  }
  0x7c   :  { %1868 = vmatpush1.bf16.msra.mxu0 %v3345_v52  ;;  %1826 = vmatprep.subr.bf16.mxu1 %v3346_v53  ;;  %v3388_v52 = vld [vmem:[#allocation6 + $0x420] ss:$16 sps:$4 sm:$0xff]   ;;  %v3391_v53 = vld [vmem:[#allocation6 + $0x28] ss:$16 sps:$4 sm:$0xff]  }
  0x7d   :  { %1869 = vmatprep.subr.bf16.mxu0 %v3348_v55  ;;  %v3399_v55 = vld [vmem:[#allocation6 + $0x4c] ss:$16 sps:$4 sm:$0xff]  }
  0x7f   :  { %1827 = vmatpush1.bf16.msra.mxu1 %v3350_v57  ;;  %v3397_v57 = vld [vmem:[#allocation6 + $0x48] ss:$16 sps:$4 sm:$0xff]  }
  0x80   :  { %1870 = vmatpush1.bf16.msra.mxu0 %v3351_v58  ;;  %1828 = vmatprep.subr.bf16.mxu1 %v3352_v61  ;;  %v3402_v58 = vld [vmem:[#allocation6 + $0x464] ss:$16 sps:$4 sm:$0xff]   ;;  %v3403_v61 = vld [vmem:[#allocation6 + $0x68] ss:$16 sps:$4 sm:$0xff]  }
  0x81   :  { %1871 = vmatprep.subr.bf16.mxu0 %v3354_v62  ;;  %v3408_v62 = vld [vmem:[#allocation6 + $0x484] ss:$16 sps:$4 sm:$0xff]  }
  0x83   :  { %1829 = vmatpush1.bf16.msra.mxu1 %v3356_v9  ;;  %v3421_v9 = vld [vmem:[#allocation6 + $0xc8] ss:$16 sps:$4 sm:$0xff]  }
  0x84   :  { %1872 = vmatpush1.bf16.msra.mxu0 %v3357_v10  ;;  %1830 = vmatprep.subr.bf16.mxu1 %v3358_v12  ;;  %v3426_v10 = vld [vmem:[#allocation6 + $0x4e4] ss:$16 sps:$4 sm:$0xff]   ;;  %v3424_v12 = vld [vmem:[#allocation6 + $0x4e0] ss:$16 sps:$4 sm:$0xff]  }
  0x85   :  { %1873 = vmatprep.subr.bf16.mxu0 %v3360_v14  ;;  %v3432_v14 = vld [vmem:[#allocation6 + $0x504] ss:$16 sps:$4 sm:$0xff]  }
  0x87   :  { %1831 = vmatpush1.bf16.msra.mxu1 %v3362_v20  ;;  %v3436_v20 = vld [vmem:[#allocation6 + $0x520] ss:$16 sps:$4 sm:$0xff]  }
  0x88   :  { %1874 = vmatpush1.bf16.msra.mxu0 %v3363_v21  ;;  %1832 = vmatprep.subr.bf16.mxu1 %v3364_v26  ;;  %v3439_v21 = vld [vmem:[#allocation6 + $0x128] ss:$16 sps:$4 sm:$0xff]  }
  0x89   :  { %1875 = vmatprep.subr.bf16.mxu0 %v3366_v27  ;;  %v3445_v26 = vld [vmem:[#allocation6 + $0x148] ss:$16 sps:$4 sm:$0xff]   ;;  %v3450_v27 = vld [vmem:[#allocation6 + $0x564] ss:$16 sps:$4 sm:$0xff]  }
  0x8b   :  { %1833 = vmatpush1.bf16.msra.mxu1 %v3368_v32  ;;  %v3459_v32 = vld [vmem:[#allocation6 + $0x18c] ss:$16 sps:$4 sm:$0xff]  }
  0x8c   :  { %1876 = vmatpush1.bf16.msra.mxu0 %v3369_v33  ;;  %1974 = vmatprep.subr.bf16.mxu1 %v3387_v37  ;;  %v3454_v33 = vld [vmem:[#allocation6 + $0x580] ss:$16 sps:$4 sm:$0xff]  }
  0x8d   :  { %1888 = vmatprep.subr.bf16.mxu0 %v3384_v36  ;;  %v3465_v36 = vld [vmem:[#allocation6 + $0x1ac] ss:$16 sps:$4 sm:$0xff]   ;;  %v3460_v37 = vld [vmem:[#allocation6 + $0x5a0] ss:$16 sps:$4 sm:$0xff]  }
  0x8e   :  { %1835 = vmatmul.mubr.bf16.vlgmr.msra.gmra.mrb[0].mxu1 %v4037_v42 }
  0x8f   :  { %1878 = vmatmul.mubr.bf16.vlgmr.msra.gmra.mrb[0].mxu0 %v4039_v45  ;;  %1975 = vmatpush1.bf16.msra.mxu1 %v3385_v44  ;;  %v3466_v44 = vld [vmem:[#allocation6 + $0x5c0] ss:$16 sps:$4 sm:$0xff]  }
  0x90   :  { %1889 = vmatpush1.bf16.msra.mxu0 %v3382_v43  ;;  %1976 = vmatprep.subr.bf16.mxu1 %v3393_v50  ;;  %v3471_v43 = vld [vmem:[#allocation6 + $0x1cc] ss:$16 sps:$4 sm:$0xff]   ;;  %v3474_v50 = vld [vmem:[#allocation6 + $0x5e4] ss:$16 sps:$4 sm:$0xff]  }
  0x91   :  { %1890 = vmatprep.subr.bf16.mxu0 %v3390_v46  ;;  %1920 = vmatprep.mubr.bf16.mxu0 %v4047_v51  ;;  %v3469_v46 = vld [vmem:[#allocation6 + $0x1c8] ss:$16 sps:$4 sm:$0xff]  }
  0x92   :  { %2006 = vmatprep.mubr.bf16.mxu1 %v510_v22  ;;  %v3444_v22 = vld [vmem:[#allocation6 + $0x544] ss:$16 sps:$4 sm:$0xff]  }
  0x93   :  { %1977 = vmatpush1.bf16.msra.mxu1 %v3391_v53  ;;  %v3472_v53 = vld [vmem:[#allocation6 + $0x5e0] ss:$16 sps:$4 sm:$0xff]  }
  0x94   :  { %1891 = vmatpush1.bf16.msra.mxu0 %v3388_v52  ;;  %1978 = vmatprep.subr.bf16.mxu1 %v3399_v55  ;;  %v3477_v52 = vld [vmem:[#allocation6 + $0x1ec] ss:$16 sps:$4 sm:$0xff]   ;;  %v3480_v55 = vld [vmem:[#allocation6 + $0x604] ss:$16 sps:$4 sm:$0xff]  }
  0x95   :  { %1892 = vmatprep.subr.bf16.mxu0 %v3396_v54  ;;  %v3475_v54 = vld [vmem:[#allocation6 + $0x1e8] ss:$16 sps:$4 sm:$0xff]  }
  0x97   :  { %1979 = vmatpush1.bf16.msra.mxu1 %v3397_v57  ;;  %v3478_v57 = vld [vmem:[#allocation6 + $0x600] ss:$16 sps:$4 sm:$0xff]  }
  0x98   :  { %1893 = vmatpush1.bf16.msra.mxu0 %v3394_v56  ;;  %1980 = vmatprep.subr.bf16.mxu1 %v3405_v59  ;;  %v3483_v56 = vld [vmem:[#allocation6 + $0x20c] ss:$16 sps:$4 sm:$0xff]   ;;  %v4054_v59 = vcombine.low %v4032_v40, %v4035_v41  ;;  %v3490_v40 = vld [vmem:[#allocation6 + $0x640] ss:$16 sps:$4 sm:$0xff]   ;;  %v3493_v41 = vld [vmem:[#allocation6 + $0x248] ss:$16 sps:$4 sm:$0xff]  }
  0x99   :  { %1894 = vmatprep.subr.bf16.mxu0 %v3402_v58  ;;  %v3481_v58 = vld [vmem:[#allocation6 + $0x208] ss:$16 sps:$4 sm:$0xff]  }
  0x9b   :  { %1981 = vmatpush1.bf16.msra.mxu1 %v3403_v61  ;;  %v3489_v61 = vld [vmem:[#allocation6 + $0x22c] ss:$16 sps:$4 sm:$0xff]  }
  0x9c   :  { %1895 = vmatpush1.bf16.msra.mxu0 %v3400_v60  ;;  %1982 = vmatprep.subr.bf16.mxu1 %v3411_v63  ;;  %v3486_v60 = vld [vmem:[#allocation6 + $0x624] ss:$16 sps:$4 sm:$0xff]   ;;  %v3487_v63 = vld [vmem:[#allocation6 + $0x228] ss:$16 sps:$4 sm:$0xff]  }
  0x9d   :  { %1896 = vmatprep.subr.bf16.mxu0 %v3408_v62  ;;  %v3484_v62 = vld [vmem:[#allocation6 + $0x620] ss:$16 sps:$4 sm:$0xff]  }
  0x9f   :  { %1983 = vmatpush1.bf16.msra.mxu1 %v3409_v1  ;;  %v3495_v1 = vld [vmem:[#allocation6 + $0x24c] ss:$16 sps:$4 sm:$0xff]  }
  0xa0   :  { %1897 = vmatpush1.bf16.msra.mxu0 %v3406_v0  ;;  %1984 = vmatprep.subr.bf16.mxu1 %v3417_v3  ;;  %v3492_v0 = vld [vmem:[#allocation6 + $0x644] ss:$16 sps:$4 sm:$0xff]   ;;  %v3496_v3 = vld [vmem:[#allocation6 + $0x660] ss:$16 sps:$4 sm:$0xff]  }
  0xa1   :  { %1898 = vmatprep.subr.bf16.mxu0 %v3414_v2  ;;  %v3498_v2 = vld [vmem:[#allocation6 + $0x664] ss:$16 sps:$4 sm:$0xff]  }
  0xa3   :  { %1985 = vmatpush1.bf16.msra.mxu1 %v3415_v5  ;;  %v3504_v5 = vld [vmem:[#allocation6 + $0x684] ss:$16 sps:$4 sm:$0xff]  }
  0xa4   :  { %1899 = vmatpush1.bf16.msra.mxu0 %v3412_v4  ;;  %1986 = vmatprep.subr.bf16.mxu1 %v3423_v7  ;;  %v3499_v4 = vld [vmem:[#allocation6 + $0x268] ss:$16 sps:$4 sm:$0xff]   ;;  %v3502_v7 = vld [vmem:[#allocation6 + $0x680] ss:$16 sps:$4 sm:$0xff]  }
  0xa5   :  { %1900 = vmatprep.subr.bf16.mxu0 %v3420_v6  ;;  %v3507_v6 = vld [vmem:[#allocation6 + $0x28c] ss:$16 sps:$4 sm:$0xff]  }
  0xa7   :  { %1987 = vmatpush1.bf16.msra.mxu1 %v3421_v9  ;;  %v3513_v9 = vld [vmem:[#allocation6 + $0x2ac] ss:$16 sps:$4 sm:$0xff]  }
  0xa8   :  { %1901 = vmatpush1.bf16.msra.mxu0 %v3418_v8  ;;  %1988 = vmatprep.subr.bf16.mxu1 %v3429_v11  ;;  %v3505_v8 = vld [vmem:[#allocation6 + $0x288] ss:$16 sps:$4 sm:$0xff]  }
  0xa9   :  { %1902 = vmatprep.subr.bf16.mxu0 %v3426_v10  ;;  %v3508_v10 = vld [vmem:[#allocation6 + $0x6a0] ss:$16 sps:$4 sm:$0xff]   ;;  %v3511_v11 = vld [vmem:[#allocation6 + $0x2a8] ss:$16 sps:$4 sm:$0xff]  }
  0xab   :  { %1989 = vmatpush1.bf16.msra.mxu1 %v3427_v13  ;;  %v3519_v13 = vld [vmem:[#allocation6 + $0x2cc] ss:$16 sps:$4 sm:$0xff]  }
  0xac   :  { %1903 = vmatpush1.bf16.msra.mxu0 %v3424_v12  ;;  %1990 = vmatprep.subr.bf16.mxu1 %v3435_v15  ;;  %v3516_v12 = vld [vmem:[#allocation6 + $0x6c4] ss:$16 sps:$4 sm:$0xff]   ;;  %v3517_v15 = vld [vmem:[#allocation6 + $0x2c8] ss:$16 sps:$4 sm:$0xff]  }
  0xad   :  { %1904 = vmatprep.subr.bf16.mxu0 %v3432_v14  ;;  %v3514_v14 = vld [vmem:[#allocation6 + $0x6c0] ss:$16 sps:$4 sm:$0xff]  }
  0xaf   :  { %1991 = vmatpush1.bf16.msra.mxu1 %v3433_v17  ;;  %v3525_v17 = vld [vmem:[#allocation6 + $0x2ec] ss:$16 sps:$4 sm:$0xff]  }
  0xb0   :  { %1905 = vmatpush1.bf16.msra.mxu0 %v3430_v16  ;;  %1992 = vmatprep.subr.bf16.mxu1 %v3441_v19  ;;  %v3522_v16 = vld [vmem:[#allocation6 + $0x6e4] ss:$16 sps:$4 sm:$0xff]   ;;  %v3523_v19 = vld [vmem:[#allocation6 + $0x2e8] ss:$16 sps:$4 sm:$0xff]  }
  0xb1   :  { %1906 = vmatprep.subr.bf16.mxu0 %v3438_v18  ;;  %v3520_v18 = vld [vmem:[#allocation6 + $0x6e0] ss:$16 sps:$4 sm:$0xff]  }
  0xb3   :  { %1993 = vmatpush1.bf16.msra.mxu1 %v3439_v21  ;;  %v3531_v21 = vld [vmem:[#allocation6 + $0x30c] ss:$16 sps:$4 sm:$0xff]  }
  0xb4   :  { %1907 = vmatpush1.bf16.msra.mxu0 %v3436_v20  ;;  %1994 = vmatprep.subr.bf16.mxu1 %v3447_v23  ;;  %v3528_v20 = vld [vmem:[#allocation6 + $0x704] ss:$16 sps:$4 sm:$0xff]   ;;  %v3529_v23 = vld [vmem:[#allocation6 + $0x308] ss:$16 sps:$4 sm:$0xff]  }
  0xb5   :  { %1908 = vmatprep.subr.bf16.mxu0 %v3444_v22  ;;  %v3526_v22 = vld [vmem:[#allocation6 + $0x700] ss:$16 sps:$4 sm:$0xff]  }
  0xb7   :  { %1995 = vmatpush1.bf16.msra.mxu1 %v3445_v26  ;;  %v3537_v26 = vld [vmem:[#allocation6 + $0x32c] ss:$16 sps:$4 sm:$0xff]  }
  0xb8   :  { %1909 = vmatpush1.bf16.msra.mxu0 %v3442_v24  ;;  %1996 = vmatprep.subr.bf16.mxu1 %v3453_v28  ;;  %v3534_v24 = vld [vmem:[#allocation6 + $0x724] ss:$16 sps:$4 sm:$0xff]   ;;  %v3535_v28 = vld [vmem:[#allocation6 + $0x328] ss:$16 sps:$4 sm:$0xff]  }
  0xb9   :  { %1910 = vmatprep.subr.bf16.mxu0 %v3450_v27  ;;  %v3532_v27 = vld [vmem:[#allocation6 + $0x720] ss:$16 sps:$4 sm:$0xff]  }
  0xbb   :  { %1997 = vmatpush1.bf16.msra.mxu1 %v3451_v30  ;;  %v3543_v30 = vld [vmem:[#allocation6 + $0x34c] ss:$16 sps:$4 sm:$0xff]  }
  0xbc   :  { %1911 = vmatpush1.bf16.msra.mxu0 %v3448_v29  ;;  %1998 = vmatprep.subr.bf16.mxu1 %v3459_v32  ;;  %v3540_v29 = vld [vmem:[#allocation6 + $0x744] ss:$16 sps:$4 sm:$0xff]   ;;  %v3541_v32 = vld [vmem:[#allocation6 + $0x348] ss:$16 sps:$4 sm:$0xff]  }
  0xbd   :  { %1912 = vmatprep.subr.bf16.mxu0 %v3456_v31  ;;  %v3538_v31 = vld [vmem:[#allocation6 + $0x740] ss:$16 sps:$4 sm:$0xff]  }
  0xbf   :  { %1999 = vmatpush1.bf16.msra.mxu1 %v3457_v34  ;;  %v3549_v34 = vld [vmem:[#allocation6 + $0x36c] ss:$16 sps:$4 sm:$0xff]  }
  0xc0   :  { %1913 = vmatpush1.bf16.msra.mxu0 %v3454_v33  ;;  %2000 = vmatprep.subr.bf16.mxu1 %v3465_v36  ;;  %v3546_v33 = vld [vmem:[#allocation6 + $0x764] ss:$16 sps:$4 sm:$0xff]   ;;  %v3547_v36 = vld [vmem:[#allocation6 + $0x368] ss:$16 sps:$4 sm:$0xff]  }
  0xc1   :  { %1914 = vmatprep.subr.bf16.mxu0 %v3462_v35  ;;  %v3544_v35 = vld [vmem:[#allocation6 + $0x760] ss:$16 sps:$4 sm:$0xff]  }
  0xc3   :  { %2001 = vmatpush1.bf16.msra.mxu1 %v3463_v38  ;;  %v3555_v38 = vld [vmem:[#allocation6 + $0x38c] ss:$16 sps:$4 sm:$0xff]  }
  0xc4   :  { %1915 = vmatpush1.bf16.msra.mxu0 %v3460_v37  ;;  %2002 = vmatprep.subr.bf16.mxu1 %v3471_v43  ;;  %v3552_v37 = vld [vmem:[#allocation6 + $0x784] ss:$16 sps:$4 sm:$0xff]   ;;  %v3553_v43 = vld [vmem:[#allocation6 + $0x388] ss:$16 sps:$4 sm:$0xff]  }
  0xc5   :  { %1916 = vmatprep.subr.bf16.mxu0 %v3468_v39  ;;  %v3550_v39 = vld [vmem:[#allocation6 + $0x780] ss:$16 sps:$4 sm:$0xff]  }
  0xc7   :  { %2003 = vmatpush1.bf16.msra.mxu1 %v3469_v46  ;;  %v3561_v46 = vld [vmem:[#allocation6 + $0x3ac] ss:$16 sps:$4 sm:$0xff]  }
  0xc8   :  { %1917 = vmatpush1.bf16.msra.mxu0 %v3466_v44  ;;  %2004 = vmatprep.subr.bf16.mxu1 %v3477_v52  ;;  %v3558_v44 = vld [vmem:[#allocation6 + $0x7a4] ss:$16 sps:$4 sm:$0xff]   ;;  %v3559_v52 = vld [vmem:[#allocation6 + $0x3a8] ss:$16 sps:$4 sm:$0xff]  }
  0xc9   :  { %1918 = vmatprep.subr.bf16.mxu0 %v3474_v50  ;;  %v3556_v50 = vld [vmem:[#allocation6 + $0x7a0] ss:$16 sps:$4 sm:$0xff]  }
  0xcb   :  { %2005 = vmatpush1.bf16.msra.mxu1 %v3475_v54  ;;  %v3567_v54 = vld [vmem:[#allocation6 + $0x3cc] ss:$16 sps:$4 sm:$0xff]  }
  0xcc   :  { %1919 = vmatpush1.bf16.msra.mxu0 %v3472_v53  ;;  %2017 = vmatprep.subr.bf16.mxu1 %v3483_v56  ;;  %v3564_v53 = vld [vmem:[#allocation6 + $0x7c4] ss:$16 sps:$4 sm:$0xff]   ;;  %v3565_v56 = vld [vmem:[#allocation6 + $0x3c8] ss:$16 sps:$4 sm:$0xff]  }
  0xcd   :  { %1931 = vmatprep.subr.bf16.mxu0 %v3480_v55  ;;  %v3562_v55 = vld [vmem:[#allocation6 + $0x7c0] ss:$16 sps:$4 sm:$0xff]  }
  0xce   :  { %2007 = vmatmul.mubr.bf16.vlgmr.msra.gmra.mrb[4].mxu1 %v4037_v42  ;;  %v3501_v42 = vld [vmem:[#allocation6 + $0x26c] ss:$16 sps:$4 sm:$0xff]  }
  0xcf   :  { %1921 = vmatmul.mubr.bf16.vlgmr.msra.gmra.mrb[0].mxu0 %v4054_v59  ;;  %2018 = vmatpush1.bf16.msra.mxu1 %v3481_v58  ;;  %v3573_v58 = vld [vmem:[#allocation6 + $0x3ec] ss:$16 sps:$4 sm:$0xff]  }
  0xd0   :  { %1932 = vmatpush1.bf16.msra.mxu0 %v3478_v57  ;;  %2019 = vmatprep.subr.bf16.mxu1 %v3489_v61  ;;  %v3570_v57 = vld [vmem:[#allocation6 + $0x7e4] ss:$16 sps:$4 sm:$0xff]   ;;  %v3571_v61 = vld [vmem:[#allocation6 + $0x3e8] ss:$16 sps:$4 sm:$0xff]  }
  0xd1   :  { %1933 = vmatprep.subr.bf16.mxu0 %v3486_v60  ;;  %1963 = vmatprep.mubr.bf16.mxu0 %v4041_v48  ;;  %v3568_v60 = vld [vmem:[#allocation6 + $0x7e0] ss:$16 sps:$4 sm:$0xff]  }
  0xd2   :  { %2049 = vmatprep.mubr.bf16.mxu1 %v4024_v25  ;;  %v3510_v25 = vld [vmem:[#allocation6 + $0x6a4] ss:$16 sps:$4 sm:$0xff]  }
  0xd3   :  { %2020 = vmatpush1.bf16.msra.mxu1 %v3487_v63  ;;  %v3574_v63 = vld [vmem:[#allocation6 + $0x408] ss:$16 sps:$4 sm:$0xff]  }
  0xd4   :  { %1934 = vmatpush1.bf16.msra.mxu0 %v3484_v62  ;;  %2021 = vmatprep.subr.bf16.mxu1 %v3495_v1  ;;  %v3576_v62 = vld [vmem:[#allocation6 + $0x40c] ss:$16 sps:$4 sm:$0xff]   ;;  %v3670_v1 = vld [vmem:[#allocation8] ss:$8 sps:$4 sm:$0xff]  }
  0xd5   :  { %1935 = vmatprep.subr.bf16.mxu0 %v3492_v0  ;;  %v3579_v0 = vld [vmem:[#allocation6 + $0x42c] ss:$16 sps:$4 sm:$0xff]  }
  0xd7   :  { %2022 = vmatpush1.bf16.msra.mxu1 %v3493_v41  ;;  %v3577_v41 = vld [vmem:[#allocation6 + $0x428] ss:$16 sps:$4 sm:$0xff]  }
  0xd8   :  { %1936 = vmatpush1.bf16.msra.mxu0 %v3490_v40  ;;  %2023 = vmatprep.subr.bf16.mxu1 %v3501_v42  ;;  %v3672_v40 = vld [vmem:[#allocation8 + $0x4] ss:$8 sps:$4 sm:$0xff]  }
  0xd9   :  { %1937 = vmatprep.subr.bf16.mxu0 %v3498_v2  ;;  %v3675_v2 = vld [vmem:[#allocation8 + $0x14] ss:$8 sps:$4 sm:$0xff]  }
  0xda   :  { %v3582_v42 = vld [vmem:[#allocation6 + $0x44c] ss:$16 sps:$4 sm:$0xff]  }
  0xdb   :  { %2024 = vmatpush1.bf16.msra.mxu1 %v3499_v4  ;;  %v3678_v4 = vld [vmem:[#allocation8 + $0x24] ss:$8 sps:$4 sm:$0xff]  }
  0xdc   :  { %1938 = vmatpush1.bf16.msra.mxu0 %v3496_v3  ;;  %2025 = vmatprep.subr.bf16.mxu1 %v3507_v6  ;;  %v3673_v3 = vld [vmem:[#allocation8 + $0x10] ss:$8 sps:$4 sm:$0xff]   ;;  %v3585_v6 = vld [vmem:[#allocation6 + $0x46c] ss:$16 sps:$4 sm:$0xff]  }
  0xdd   :  { %1939 = vmatprep.subr.bf16.mxu0 %v3504_v5  ;;  %v3580_v5 = vld [vmem:[#allocation6 + $0x448] ss:$16 sps:$4 sm:$0xff]  }
  0xdf   :  { %2026 = vmatpush1.bf16.msra.mxu1 %v3505_v8  ;;  %v3588_v8 = vld [vmem:[#allocation6 + $0x48c] ss:$16 sps:$4 sm:$0xff]  }
  0xe0   :  { %1940 = vmatpush1.bf16.msra.mxu0 %v3502_v7  ;;  %2027 = vmatprep.subr.bf16.mxu1 %v3513_v9  ;;  %v3583_v7 = vld [vmem:[#allocation6 + $0x468] ss:$16 sps:$4 sm:$0xff]   ;;  %v3684_v9 = vld [vmem:[#allocation8 + $0x44] ss:$8 sps:$4 sm:$0xff]  }
  0xe1   :  { %1941 = vmatprep.subr.bf16.mxu0 %v3510_v25  ;;  %v3681_v25 = vld [vmem:[#allocation8 + $0x34] ss:$8 sps:$4 sm:$0xff]  }
  0xe3   :  { %2028 = vmatpush1.bf16.msra.mxu1 %v3511_v11  ;;  %v3591_v11 = vld [vmem:[#allocation6 + $0x4ac] ss:$16 sps:$4 sm:$0xff]  }
  0xe4   :  { %1942 = vmatpush1.bf16.msra.mxu0 %v3508_v10  ;;  %2029 = vmatprep.subr.bf16.mxu1 %v3519_v13  ;;  %v3586_v10 = vld [vmem:[#allocation6 + $0x488] ss:$16 sps:$4 sm:$0xff]   ;;  %v3687_v13 = vld [vmem:[#allocation8 + $0x54] ss:$8 sps:$4 sm:$0xff]  }
  0xe5   :  { %1943 = vmatprep.subr.bf16.mxu0 %v3516_v12  ;;  %v3682_v12 = vld [vmem:[#allocation8 + $0x40] ss:$8 sps:$4 sm:$0xff]  }
  0xe7   :  { %2030 = vmatpush1.bf16.msra.mxu1 %v3517_v15  ;;  %v3594_v15 = vld [vmem:[#allocation6 + $0x4cc] ss:$16 sps:$4 sm:$0xff]  }
  0xe8   :  { %1944 = vmatpush1.bf16.msra.mxu0 %v3514_v14  ;;  %2031 = vmatprep.subr.bf16.mxu1 %v3525_v17  ;;  %v3589_v14 = vld [vmem:[#allocation6 + $0x4a8] ss:$16 sps:$4 sm:$0xff]   ;;  %v3690_v17 = vld [vmem:[#allocation8 + $0x64] ss:$8 sps:$4 sm:$0xff]  }
  0xe9   :  { %1945 = vmatprep.subr.bf16.mxu0 %v3522_v16  ;;  %v3685_v16 = vld [vmem:[#allocation8 + $0x50] ss:$8 sps:$4 sm:$0xff]  }
  0xeb   :  { %2032 = vmatpush1.bf16.msra.mxu1 %v3523_v19  ;;  %v3597_v19 = vld [vmem:[#allocation6 + $0x4ec] ss:$16 sps:$4 sm:$0xff]  }
  0xec   :  { %1946 = vmatpush1.bf16.msra.mxu0 %v3520_v18  ;;  %2033 = vmatprep.subr.bf16.mxu1 %v3531_v21  ;;  %v3592_v18 = vld [vmem:[#allocation6 + $0x4c8] ss:$16 sps:$4 sm:$0xff]   ;;  %v3693_v21 = vld [vmem:[#allocation8 + $0x74] ss:$8 sps:$4 sm:$0xff]  }
  0xed   :  { %1947 = vmatprep.subr.bf16.mxu0 %v3528_v20  ;;  %v3688_v20 = vld [vmem:[#allocation8 + $0x60] ss:$8 sps:$4 sm:$0xff]  }
  0xef   :  { %2034 = vmatpush1.bf16.msra.mxu1 %v3529_v23  ;;  %v3600_v23 = vld [vmem:[#allocation6 + $0x50c] ss:$16 sps:$4 sm:$0xff]  }
  0xf0   :  { %1948 = vmatpush1.bf16.msra.mxu0 %v3526_v22  ;;  %2035 = vmatprep.subr.bf16.mxu1 %v3537_v26  ;;  %v3595_v22 = vld [vmem:[#allocation6 + $0x4e8] ss:$16 sps:$4 sm:$0xff]   ;;  %v3696_v26 = vld [vmem:[#allocation8 + $0x84] ss:$8 sps:$4 sm:$0xff]  }
  0xf1   :  { %1949 = vmatprep.subr.bf16.mxu0 %v3534_v24  ;;  %v3691_v24 = vld [vmem:[#allocation8 + $0x70] ss:$8 sps:$4 sm:$0xff]  }
  0xf3   :  { %2036 = vmatpush1.bf16.msra.mxu1 %v3535_v28  ;;  %v3603_v28 = vld [vmem:[#allocation6 + $0x52c] ss:$16 sps:$4 sm:$0xff]  }
  0xf4   :  { %1950 = vmatpush1.bf16.msra.mxu0 %v3532_v27  ;;  %2037 = vmatprep.subr.bf16.mxu1 %v3543_v30  ;;  %v3598_v27 = vld [vmem:[#allocation6 + $0x508] ss:$16 sps:$4 sm:$0xff]   ;;  %v3699_v30 = vld [vmem:[#allocation8 + $0x94] ss:$8 sps:$4 sm:$0xff]  }
  0xf5   :  { %1951 = vmatprep.subr.bf16.mxu0 %v3540_v29  ;;  %v3694_v29 = vld [vmem:[#allocation8 + $0x80] ss:$8 sps:$4 sm:$0xff]  }
  0xf7   :  { %2038 = vmatpush1.bf16.msra.mxu1 %v3541_v32  ;;  %v3606_v32 = vld [vmem:[#allocation6 + $0x54c] ss:$16 sps:$4 sm:$0xff]  }
  0xf8   :  { %1952 = vmatpush1.bf16.msra.mxu0 %v3538_v31  ;;  %2039 = vmatprep.subr.bf16.mxu1 %v3549_v34  ;;  %v3601_v31 = vld [vmem:[#allocation6 + $0x528] ss:$16 sps:$4 sm:$0xff]   ;;  %v3702_v34 = vld [vmem:[#allocation8 + $0xa4] ss:$8 sps:$4 sm:$0xff]  }
  0xf9   :  { %1953 = vmatprep.subr.bf16.mxu0 %v3546_v33  ;;  %v3697_v33 = vld [vmem:[#allocation8 + $0x90] ss:$8 sps:$4 sm:$0xff]  }
  0xfb   :  { %2040 = vmatpush1.bf16.msra.mxu1 %v3547_v36  ;;  %v3609_v36 = vld [vmem:[#allocation6 + $0x56c] ss:$16 sps:$4 sm:$0xff]  }
  0xfc   :  { %1954 = vmatpush1.bf16.msra.mxu0 %v3544_v35  ;;  %2041 = vmatprep.subr.bf16.mxu1 %v3555_v38  ;;  %v3604_v35 = vld [vmem:[#allocation6 + $0x548] ss:$16 sps:$4 sm:$0xff]   ;;  %v3705_v38 = vld [vmem:[#allocation8 + $0xb4] ss:$8 sps:$4 sm:$0xff]  }
  0xfd   :  { %1955 = vmatprep.subr.bf16.mxu0 %v3552_v37  ;;  %v3700_v37 = vld [vmem:[#allocation8 + $0xa0] ss:$8 sps:$4 sm:$0xff]  }
  0xff   :  { %2042 = vmatpush1.bf16.msra.mxu1 %v3553_v43  ;;  %v3612_v43 = vld [vmem:[#allocation6 + $0x58c] ss:$16 sps:$4 sm:$0xff]  }
 0x100   :  { %1956 = vmatpush1.bf16.msra.mxu0 %v3550_v39  ;;  %2043 = vmatprep.subr.bf16.mxu1 %v3561_v46  ;;  %v3607_v39 = vld [vmem:[#allocation6 + $0x568] ss:$16 sps:$4 sm:$0xff]   ;;  %v3708_v46 = vld [vmem:[#allocation8 + $0xc4] ss:$8 sps:$4 sm:$0xff]  }
 0x101   :  { %1957 = vmatprep.subr.bf16.mxu0 %v3558_v44  ;;  %v3703_v44 = vld [vmem:[#allocation8 + $0xb0] ss:$8 sps:$4 sm:$0xff]  }
 0x103   :  { %2044 = vmatpush1.bf16.msra.mxu1 %v3559_v52  ;;  %v3615_v52 = vld [vmem:[#allocation6 + $0x5ac] ss:$16 sps:$4 sm:$0xff]  }
 0x104   :  { %1958 = vmatpush1.bf16.msra.mxu0 %v3556_v50  ;;  %2045 = vmatprep.subr.bf16.mxu1 %v3567_v54  ;;  %v3610_v50 = vld [vmem:[#allocation6 + $0x588] ss:$16 sps:$4 sm:$0xff]  }
 0x105   :  { %1959 = vmatprep.subr.bf16.mxu0 %v3564_v53  ;;  %v3706_v53 = vld [vmem:[#allocation8 + $0xc0] ss:$8 sps:$4 sm:$0xff]  }
 0x106   :  { %v3613_v54 = vld [vmem:[#allocation6 + $0x5a8] ss:$16 sps:$4 sm:$0xff]  }
 0x107   :  { %2046 = vmatpush1.bf16.msra.mxu1 %v3565_v56  ;;  %v3616_v56 = vld [vmem:[#allocation6 + $0x5c8] ss:$16 sps:$4 sm:$0xff]  }
 0x108   :  { %1960 = vmatpush1.bf16.msra.mxu0 %v3562_v55  ;;  %2047 = vmatprep.subr.bf16.mxu1 %v3573_v58  ;;  %v3618_v55 = vld [vmem:[#allocation6 + $0x5cc] ss:$16 sps:$4 sm:$0xff]   ;;  %v3619_v58 = vld [vmem:[#allocation6 + $0x5e8] ss:$16 sps:$4 sm:$0xff]  }
 0x109   :  { %1961 = vmatprep.subr.bf16.mxu0 %v3570_v57  ;;  %v3621_v57 = vld [vmem:[#allocation6 + $0x5ec] ss:$16 sps:$4 sm:$0xff]  }
 0x10b   :  { %2048 = vmatpush1.bf16.msra.mxu1 %v3571_v61  ;;  %v3622_v61 = vld [vmem:[#allocation6 + $0x608] ss:$16 sps:$4 sm:$0xff]  }
 0x10c   :  { %1962 = vmatpush1.bf16.msra.mxu0 %v3568_v60  ;;  %2060 = vmatprep.subr.bf16.mxu1 %v3576_v62  ;;  %v3624_v60 = vld [vmem:[#allocation6 + $0x60c] ss:$16 sps:$4 sm:$0xff]  }
 0x10d   :  { %2570 = vmatprep.subr.bf16.mxu0 %v3672_v40  ;;  %v3627_v62 = vld [vmem:[#allocation6 + $0x62c] ss:$16 sps:$4 sm:$0xff]  }
 0x10e   :  { %2050 = vmatmul.mubr.bf16.vlgmr.msra.gmra.mrb[4].mxu1 %v4039_v45  ;;  %v3676_v45 = vld [vmem:[#allocation8 + $0x20] ss:$8 sps:$4 sm:$0xff]   ;;  %v3633_v40 = vld [vmem:[#allocation6 + $0x66c] ss:$16 sps:$4 sm:$0xff]  }
 0x10f   :  { %1964 = vmatmul.mubr.bf16.vlgmr.msra.gmra.mrb[0].mxu0 %v4045_v49  ;;  %2061 = vmatpush1.bf16.msra.mxu1 %v3574_v63  ;;  %v3625_v63 = vld [vmem:[#allocation6 + $0x628] ss:$16 sps:$4 sm:$0xff]  }
 0x110   :  { %2092 = vmatprep.mubr.bf16.mxu1 %v4047_v51  ;;  %2062 = vmatprep.subr.bf16.mxu1 %v3579_v0  ;;  %v3679_v51 = vld [vmem:[#allocation8 + $0x30] ss:$8 sps:$4 sm:$0xff]   ;;  %v3630_v0 = vld [vmem:[#allocation6 + $0x64c] ss:$16 sps:$4 sm:$0xff]  }
 0x111   :  { %2571 = vmatpush1.bf16.msra.mxu0 %v3670_v1  ;;  %v3628_v1 = vld [vmem:[#allocation6 + $0x648] ss:$16 sps:$4 sm:$0xff]  }
 0x112   :  { %2572 = vmatprep.subr.bf16.mxu0 %v3675_v2  ;;  %v3636_v2 = vld [vmem:[#allocation6 + $0x68c] ss:$16 sps:$4 sm:$0xff]  }
 0x113   :  { %2063 = vmatpush1.bf16.msra.mxu1 %v3577_v41  ;;  %v3631_v41 = vld [vmem:[#allocation6 + $0x668] ss:$16 sps:$4 sm:$0xff]  }
 0x114   :  { %2064 = vmatprep.subr.bf16.mxu1 %v3582_v42  ;;  %v3634_v42 = vld [vmem:[#allocation6 + $0x688] ss:$16 sps:$4 sm:$0xff]  }
 0x115   :  { %2573 = vmatpush1.bf16.msra.mxu0 %v3673_v3  ;;  %v3639_v3 = vld [vmem:[#allocation6 + $0x6ac] ss:$16 sps:$4 sm:$0xff]  }
 0x116   :  { %2574 = vmatprep.subr.bf16.mxu0 %v3678_v4  ;;  %v3711_v4 = vld [vmem:[#allocation8 + $0xd4] ss:$8 sps:$4 sm:$0xff]  }
 0x117   :  { %2065 = vmatpush1.bf16.msra.mxu1 %v3580_v5  ;;  %v3642_v5 = vld [vmem:[#allocation6 + $0x6cc] ss:$16 sps:$4 sm:$0xff]  }
 0x118   :  { %2066 = vmatprep.subr.bf16.mxu1 %v3585_v6 }
 0x119   :  { %2575 = vmatpush1.bf16.msra.mxu0 %v3676_v45 }
 0x11a   :  { %2576 = vmatprep.subr.bf16.mxu0 %v3681_v25  ;;  %v3714_v25 = vld [vmem:[#allocation8 + $0xe4] ss:$8 sps:$4 sm:$0xff]  }
 0x11b   :  { %2067 = vmatpush1.bf16.msra.mxu1 %v3583_v7 }
 0x11c   :  { %2068 = vmatprep.subr.bf16.mxu1 %v3588_v8  ;;  %v3640_v8 = vld [vmem:[#allocation6 + $0x6c8] ss:$16 sps:$4 sm:$0xff]  }
 0x11d   :  { %2577 = vmatpush1.bf16.msra.mxu0 %v3679_v51 }
 0x11e   :  { %2578 = vmatprep.subr.bf16.mxu0 %v3684_v9  ;;  %v3645_v9 = vld [vmem:[#allocation6 + $0x6ec] ss:$16 sps:$4 sm:$0xff]  }
 0x11f   :  { %2069 = vmatpush1.bf16.msra.mxu1 %v3586_v10  ;;  %v3712_v10 = vld [vmem:[#allocation8 + $0xe0] ss:$8 sps:$4 sm:$0xff]  }
 0x120   :  { %2070 = vmatprep.subr.bf16.mxu1 %v3591_v11  ;;  %v3643_v11 = vld [vmem:[#allocation6 + $0x6e8] ss:$16 sps:$4 sm:$0xff]  }
 0x121   :  { %2579 = vmatpush1.bf16.msra.mxu0 %v3682_v12  ;;  %v3717_v12 = vld [vmem:[#allocation8 + $0xf4] ss:$8 sps:$4 sm:$0xff]  }
 0x122   :  { %2580 = vmatprep.subr.bf16.mxu0 %v3687_v13  ;;  %v3648_v13 = vld [vmem:[#allocation6 + $0x70c] ss:$16 sps:$4 sm:$0xff]  }
 0x123   :  { %2071 = vmatpush1.bf16.msra.mxu1 %v3589_v14  ;;  %v3715_v14 = vld [vmem:[#allocation8 + $0xf0] ss:$8 sps:$4 sm:$0xff]  }
 0x124   :  { %2072 = vmatprep.subr.bf16.mxu1 %v3594_v15  ;;  %v3646_v15 = vld [vmem:[#allocation6 + $0x708] ss:$16 sps:$4 sm:$0xff]  }
 0x125   :  { %2581 = vmatpush1.bf16.msra.mxu0 %v3685_v16  ;;  %v3651_v16 = vld [vmem:[#allocation6 + $0x72c] ss:$16 sps:$4 sm:$0xff]  }
 0x126   :  { %2582 = vmatprep.subr.bf16.mxu0 %v3690_v17  ;;  %v3720_v17 = vld [vmem:[#allocation8 + $0x104] ss:$8 sps:$4 sm:$0xff]  }
 0x127   :  { %2073 = vmatpush1.bf16.msra.mxu1 %v3592_v18  ;;  %v3649_v18 = vld [vmem:[#allocation6 + $0x728] ss:$16 sps:$4 sm:$0xff]  }
 0x128   :  { %2074 = vmatprep.subr.bf16.mxu1 %v3597_v19  ;;  %v3654_v19 = vld [vmem:[#allocation6 + $0x74c] ss:$16 sps:$4 sm:$0xff]  }
 0x129   :  { %2583 = vmatpush1.bf16.msra.mxu0 %v3688_v20  ;;  %v3652_v20 = vld [vmem:[#allocation6 + $0x748] ss:$16 sps:$4 sm:$0xff]  }
 0x12a   :  { %2584 = vmatprep.subr.bf16.mxu0 %v3693_v21  ;;  %v3657_v21 = vld [vmem:[#allocation6 + $0x76c] ss:$16 sps:$4 sm:$0xff]  }
 0x12b   :  { %2075 = vmatpush1.bf16.msra.mxu1 %v3595_v22  ;;  %v3655_v22 = vld [vmem:[#allocation6 + $0x768] ss:$16 sps:$4 sm:$0xff]  }
 0x12c   :  { %2076 = vmatprep.subr.bf16.mxu1 %v3600_v23  ;;  %v3660_v23 = vld [vmem:[#allocation6 + $0x78c] ss:$16 sps:$4 sm:$0xff]  }
 0x12d   :  { %2585 = vmatpush1.bf16.msra.mxu0 %v3691_v24  ;;  %v3658_v24 = vld [vmem:[#allocation6 + $0x788] ss:$16 sps:$4 sm:$0xff]  }
 0x12e   :  { %2586 = vmatprep.subr.bf16.mxu0 %v3696_v26  ;;  %v3663_v26 = vld [vmem:[#allocation6 + $0x7ac] ss:$16 sps:$4 sm:$0xff]  }
 0x12f   :  { %2077 = vmatpush1.bf16.msra.mxu1 %v3598_v27  ;;  %v3661_v27 = vld [vmem:[#allocation6 + $0x7a8] ss:$16 sps:$4 sm:$0xff]  }
 0x130   :  { %2078 = vmatprep.subr.bf16.mxu1 %v3603_v28  ;;  %v3666_v28 = vld [vmem:[#allocation6 + $0x7cc] ss:$16 sps:$4 sm:$0xff]  }
 0x131   :  { %2587 = vmatpush1.bf16.msra.mxu0 %v3694_v29  ;;  %v3664_v29 = vld [vmem:[#allocation6 + $0x7c8] ss:$16 sps:$4 sm:$0xff]  }
 0x132   :  { %2588 = vmatprep.subr.bf16.mxu0 %v3699_v30  ;;  %v3669_v30 = vld [vmem:[#allocation6 + $0x7ec] ss:$16 sps:$4 sm:$0xff]  }
 0x133   :  { %2079 = vmatpush1.bf16.msra.mxu1 %v3601_v31  ;;  %v3667_v31 = vld [vmem:[#allocation6 + $0x7e8] ss:$16 sps:$4 sm:$0xff]  }
 0x134   :  { %2080 = vmatprep.subr.bf16.mxu1 %v3606_v32  ;;  %v352_v32 = vsub.s32 0, %v4009_v47 }
 0x135   :  { %2589 = vmatpush1.bf16.msra.mxu0 %v3697_v33  ;;  %v4070_v33 = vld [vmem:[%s4107_s2] sm:$0xf] }
 0x136   :  { %2590 = vmatprep.subr.bf16.mxu0 %v3702_v34  ;;  %v356_v34 = vsub.s32 1, %v4009_v47 }
 0x137   :  { %2081 = vmatpush1.bf16.msra.mxu1 %v3604_v35  ;;  %v353_v35 = vrot.slane %v4070_v33, %v352_v32 }
 0x138   :  { %2082 = vmatprep.subr.bf16.mxu1 %v3609_v36  ;;  %v357_v36 = vrot.slane %v4070_v33, %v356_v34 }
 0x139   :  { %2591 = vmatpush1.bf16.msra.mxu0 %v3700_v37 }
 0x13a   :  { %2592 = vmatprep.subr.bf16.mxu0 %v3705_v38 }
 0x13b   :  { %2083 = vmatpush1.bf16.msra.mxu1 %v3607_v39 }
 0x13c   :  { %2084 = vmatprep.subr.bf16.mxu1 %v3612_v43 }
 0x13d   :  { %2593 = vmatpush1.bf16.msra.mxu0 %v3703_v44 }
 0x13e   :  { %2594 = vmatprep.subr.bf16.mxu0 %v3708_v46 }
 0x13f   :  { %2085 = vmatpush1.bf16.msra.mxu1 %v3610_v50 }
 0x140   :  { %2086 = vmatprep.subr.bf16.mxu1 %v3615_v52 }
 0x141   :  { %2595 = vmatpush1.bf16.msra.mxu0 %v3706_v53 }
 0x142   :  { %2596 = vmatprep.subr.bf16.mxu0 %v3711_v4  ;;  %v3721_v4 = vld [vmem:[#allocation8 + $0x110] ss:$8 sps:$4 sm:$0xff]  }
 0x143   :  { %2087 = vmatpush1.bf16.msra.mxu1 %v3613_v54 }
 0x144   :  { %2088 = vmatprep.subr.bf16.mxu1 %v3618_v55 }
 0x147   :  { %2089 = vmatpush1.bf16.msra.mxu1 %v3616_v56 }
 0x148   :  { %2090 = vmatprep.subr.bf16.mxu1 %v3621_v57 }
 0x14b   :  { %2091 = vmatpush1.bf16.msra.mxu1 %v3619_v58 }
 0x14c   :  { %2103 = vmatprep.subr.bf16.mxu1 %v3624_v60 }
 0x14e   :  { %2093 = vmatmul.mubr.bf16.vlgmr.msra.gmra.mrb[4].mxu1 %v4054_v59  ;;  %v3637_v59 = vld [vmem:[#allocation6 + $0x6a8] ss:$16 sps:$4 sm:$0xff]  }
 0x14f   :  { %2104 = vmatpush1.bf16.msra.mxu1 %v3622_v61  ;;  %2135 = vmatprep.mubr.bf16.mxu1 %v4041_v48  ;;  %v3709_v48 = vld [vmem:[#allocation8 + $0xd0] ss:$8 sps:$4 sm:$0xff]  }
 0x150   :  { %2105 = vmatprep.subr.bf16.mxu1 %v3627_v62  ;;  %2597 = vmatpush1.bf16.msra.mxu0 %v3709_v48  ;;  %v3769_v48 = vld [vmem:[#allocation9 + $0x8] sm:$0xff]  }
 0x151   :  { %2598 = vmatprep.subr.bf16.mxu0 %v3714_v25  ;;  %v3772_v25 = vld [vmem:[#allocation9 + $0x58] sm:$0xff]  }
 0x153   :  { %2106 = vmatpush1.bf16.msra.mxu1 %v3625_v63 }
 0x154   :  { %2107 = vmatprep.subr.bf16.mxu1 %v3630_v0  ;;  %2599 = vmatpush1.bf16.msra.mxu0 %v3712_v10  ;;  %v3773_v10 = vld [vmem:[#allocation9 + $0x18] sm:$0xff]  }
 0x155   :  { %2600 = vmatprep.subr.bf16.mxu0 %v3717_v12  ;;  %v3730_v12 = vld [vmem:[#allocation8 + $0x140] ss:$8 sps:$4 sm:$0xff]  }
 0x157   :  { %2108 = vmatpush1.bf16.msra.mxu1 %v3628_v1 }
 0x158   :  { %2109 = vmatprep.subr.bf16.mxu1 %v3633_v40  ;;  %2601 = vmatpush1.bf16.msra.mxu0 %v3715_v14  ;;  %v3775_v14 = vld [vmem:[#allocation9 + $0x20] sm:$0xff]  }
 0x159   :  { %2613 = vmatprep.subr.bf16.mxu0 %v3720_v17  ;;  %v3736_v17 = vld [vmem:[#allocation8 + $0x160] ss:$8 sps:$4 sm:$0xff]  }
 0x15b   :  { %2110 = vmatpush1.bf16.msra.mxu1 %v3631_v41  ;;  %v3718_v41 = vld [vmem:[#allocation8 + $0x100] ss:$8 sps:$4 sm:$0xff]  }
 0x15c   :  { %2111 = vmatprep.subr.bf16.mxu1 %v3636_v2  ;;  %v3723_v2 = vld [vmem:[#allocation8 + $0x114] ss:$8 sps:$4 sm:$0xff]  }
 0x15f   :  { %2112 = vmatpush1.bf16.msra.mxu1 %v3634_v42  ;;  %v3766_v42 = vld [vmem:[#allocation9 + $0x40] sm:$0xff]  }
 0x160   :  { %2113 = vmatprep.subr.bf16.mxu1 %v3639_v3  ;;  %v3767_v3 = vld [vmem:[#allocation9] sm:$0xff]  }
 0x161   :  { %v1836_v6 = vpop.f32.mrb[0].mxu1 }
 0x162   :  { %v1838_v7 = vpop.f32.mrb[1].mxu1  ;;  %v1837_v37 = vadd.f32 %v1836_v6, %v353_v35  ;;  %v3770_v6 = vld [vmem:[#allocation9 + $0x50] sm:$0xff]  }
 0x163   :  { %v1840_v45 = vpop.f32.mrb[2].mxu1  ;;  %2114 = vmatpush1.bf16.msra.mxu1 %v3637_v59  ;;  %v1839_v38 = vadd.f32 %v1838_v7, %v357_v36  ;;  %v3768_v59 = vld [vmem:[#allocation9 + $0x48] sm:$0xff]  }
 0x164   :  { %v1842_v51 = vpop.f32.mrb[3].mxu1  ;;  %2115 = vmatprep.subr.bf16.mxu1 %v3642_v5  ;;  %v1841_v39 = vadd.f32 %v1840_v45, %v353_v35  ;;  %v3726_v5 = vld [vmem:[#allocation8 + $0x124] ss:$8 sps:$4 sm:$0xff]   ;;  %v3724_v7 = vld [vmem:[#allocation8 + $0x120] ss:$8 sps:$4 sm:$0xff]  }
 0x165   :  { %v1843_v46 = vadd.f32 %v1842_v51, %v357_v36  ;;  %v3729_v45 = vld [vmem:[#allocation8 + $0x134] ss:$8 sps:$4 sm:$0xff]   ;;  %v3727_v51 = vld [vmem:[#allocation8 + $0x130] ss:$8 sps:$4 sm:$0xff]   ;;  %v3762_v36 = vld [vmem:[#allocation8 + $0x1e4] ss:$8 sps:$4 sm:$0xff]  }
 0x166   :  { %v3757_v35 = vld [vmem:[#allocation8 + $0x1d0] ss:$8 sps:$4 sm:$0xff]  }
 0x167   :  { %2116 = vmatpush1.bf16.msra.mxu1 %v3640_v8  ;;  %v3771_v8 = vld [vmem:[#allocation9 + $0x10] sm:$0xff]  }
 0x168   :  { %2117 = vmatprep.subr.bf16.mxu1 %v3645_v9  ;;  %v3732_v9 = vld [vmem:[#allocation8 + $0x144] ss:$8 sps:$4 sm:$0xff]  }
 0x16b   :  { %2118 = vmatpush1.bf16.msra.mxu1 %v3643_v11  ;;  %v3774_v11 = vld [vmem:[#allocation9 + $0x60] sm:$0xff]  }
 0x16c   :  { %2119 = vmatprep.subr.bf16.mxu1 %v3648_v13  ;;  %v3735_v13 = vld [vmem:[#allocation8 + $0x154] ss:$8 sps:$4 sm:$0xff]  }
 0x16f   :  { %2120 = vmatpush1.bf16.msra.mxu1 %v3646_v15  ;;  %v3733_v15 = vld [vmem:[#allocation8 + $0x150] ss:$8 sps:$4 sm:$0xff]  }
 0x170   :  { %2121 = vmatprep.subr.bf16.mxu1 %v3651_v16  ;;  %v3738_v16 = vld [vmem:[#allocation8 + $0x164] ss:$8 sps:$4 sm:$0xff]  }
 0x173   :  { %2122 = vmatpush1.bf16.msra.mxu1 %v3649_v18  ;;  %v3741_v18 = vld [vmem:[#allocation8 + $0x174] ss:$8 sps:$4 sm:$0xff]  }
 0x174   :  { %2123 = vmatprep.subr.bf16.mxu1 %v3654_v19  ;;  %v3739_v19 = vld [vmem:[#allocation8 + $0x170] ss:$8 sps:$4 sm:$0xff]  }
 0x177   :  { %2124 = vmatpush1.bf16.msra.mxu1 %v3652_v20  ;;  %v3744_v20 = vld [vmem:[#allocation8 + $0x184] ss:$8 sps:$4 sm:$0xff]  }
 0x178   :  { %2125 = vmatprep.subr.bf16.mxu1 %v3657_v21  ;;  %v3742_v21 = vld [vmem:[#allocation8 + $0x180] ss:$8 sps:$4 sm:$0xff]  }
 0x17b   :  { %2126 = vmatpush1.bf16.msra.mxu1 %v3655_v22  ;;  %v3747_v22 = vld [vmem:[#allocation8 + $0x194] ss:$8 sps:$4 sm:$0xff]  }
 0x17c   :  { %2127 = vmatprep.subr.bf16.mxu1 %v3660_v23  ;;  %v3745_v23 = vld [vmem:[#allocation8 + $0x190] ss:$8 sps:$4 sm:$0xff]  }
 0x17f   :  { %2128 = vmatpush1.bf16.msra.mxu1 %v3658_v24  ;;  %v3750_v24 = vld [vmem:[#allocation8 + $0x1a4] ss:$8 sps:$4 sm:$0xff]  }
 0x180   :  { %2129 = vmatprep.subr.bf16.mxu1 %v3663_v26  ;;  %v3748_v26 = vld [vmem:[#allocation8 + $0x1a0] ss:$8 sps:$4 sm:$0xff]  }
 0x183   :  { %2130 = vmatpush1.bf16.msra.mxu1 %v3661_v27  ;;  %v3753_v27 = vld [vmem:[#allocation8 + $0x1b4] ss:$8 sps:$4 sm:$0xff]  }
 0x184   :  { %2131 = vmatprep.subr.bf16.mxu1 %v3666_v28  ;;  %v3751_v28 = vld [vmem:[#allocation8 + $0x1b0] ss:$8 sps:$4 sm:$0xff]  }
 0x187   :  { %2132 = vmatpush1.bf16.msra.mxu1 %v3664_v29  ;;  %v3756_v29 = vld [vmem:[#allocation8 + $0x1c4] ss:$8 sps:$4 sm:$0xff]  }
 0x188   :  { %2133 = vmatprep.subr.bf16.mxu1 %v3669_v30  ;;  %v3754_v30 = vld [vmem:[#allocation8 + $0x1c0] ss:$8 sps:$4 sm:$0xff]  }
 0x18b   :  { %2134 = vmatpush1.bf16.msra.mxu1 %v3667_v31  ;;  %v3759_v31 = vld [vmem:[#allocation8 + $0x1d4] ss:$8 sps:$4 sm:$0xff]  }
 0x18c   :  { %3198 = vmatprep.subr.bf16.mxu1 %v3766_v42  ;;  %v3776_v42 = vld [vmem:[#allocation9 + $0x68] sm:$0xff]  }
 0x18e   :  { %2136 = vmatmul.mubr.bf16.vlgmr.msra.gmra.mrb[4].mxu1 %v4045_v49 }
 0x18f   :  { %3199 = vmatpush3.bf16.msra.mxu1 %v3767_v3  ;;  %v3777_v3 = vld [vmem:[#allocation9 + $0x28] sm:$0xff]  }
 0x190   :  { %3200 = vmatprep.subr.bf16.mxu1 %v3768_v59  ;;  %v3778_v59 = vld [vmem:[#allocation9 + $0x70] sm:$0xff]  }
 0x193   :  { %3201 = vmatpush3.bf16.msra.mxu1 %v3769_v48  ;;  %v3781_v48 = vld [vmem:[#allocation9 + $0x38] sm:$0xff]  }
 0x194   :  { %3202 = vmatprep.subr.bf16.mxu1 %v3770_v6  ;;  %v2238_v6 = vld [vmem:[%s4109_s4] sm:$0x3] }
 0x197   :  { %3203 = vmatpush3.bf16.msra.mxu1 %v3771_v8 }
 0x198   :  { %3204 = vmatprep.subr.bf16.mxu1 %v3772_v25 }
 0x19b   :  { %3205 = vmatpush3.bf16.msra.mxu1 %v3773_v10 }
 0x19c   :  { %3206 = vmatprep.subr.bf16.mxu1 %v3774_v11 }
 0x19f   :  { %3207 = vmatpush3.bf16.msra.mxu1 %v3775_v14 }
 0x1a0   :  { %3208 = vmatprep.subr.bf16.mxu1 %v3776_v42 }
 0x1a3   :  { %3209 = vmatpush3.bf16.msra.mxu1 %v3777_v3 }
 0x1a4   :  { %3210 = vmatprep.subr.bf16.mxu1 %v3778_v59 }
 0x1e2   :  { %v1965_v49 = vpop.f32.mrb[0].mxu0 }
 0x1e3   :  { %v3221_v43 = vadd.f32 %v1965_v49, %v1837_v37  ;;  %v1967_v44 = vpop.f32.mrb[1].mxu0  ;;  %v3760_v37 = vld [vmem:[#allocation8 + $0x1e0] ss:$8 sps:$4 sm:$0xff]   ;;  %v3763_v49 = vld [vmem:[#allocation8 + $0x1f0] ss:$8 sps:$4 sm:$0xff]  }
 0x1e4   :  { %v3223_v50 = vadd.f32 %v1967_v44, %v1839_v38  ;;  %v1969_v52 = vpop.f32.mrb[2].mxu0  ;;  %v3765_v38 = vld [vmem:[#allocation8 + $0x1f4] ss:$8 sps:$4 sm:$0xff]  }
 0x1e5   :  { %v2154_v53 = vmul.f32 0.2, %v3221_v43  ;;  %v3225_v54 = vadd.f32 %v1969_v52, %v1841_v39  ;;  %v1971_v55 = vpop.f32.mrb[3].mxu0  ;;  %vm2146_vm0 = vcmp.gt.f32.partialorder %v3221_v43, 0.0  ;;  %v360_v39 = vsub.s32 2, %v4009_v47 }
 0x1e6   :  { %v2155_v56 = vmul.f32 0.2, %v3223_v50  ;;  %v3227_v57 = vadd.f32 %v1971_v55, %v1843_v46  ;;  %vm2147_vm1 = vcmp.gt.f32.partialorder %v3223_v50, 0.0 }
 0x1e7   :  { %vm2150_vm2 = vcmp.gt.f32.partialorder %v3225_v54, 0.0  ;;  %v2158_v58 = vmul.f32 0.2, %v3225_v54  ;;  %v2162_v61 = vsel %vm2146_vm0, %v3221_v43, %v2154_v53  ;;  %v364_v43 = vsub.s32 3, %v4009_v47 }
 0x1e8   :  { %vm2151_vm3 = vcmp.gt.f32.partialorder %v3227_v57, 0.0  ;;  %v2159_v60 = vmul.f32 0.2, %v3227_v57  ;;  %v2163_v0 = vsel %vm2147_vm1, %v3223_v50, %v2155_v56  ;;  %v361_v44 = vrot.slane %v4070_v33, %v360_v39 }
 0x1e9   :  { %v2166_v62 = vsel %vm2150_vm2, %v3225_v54, %v2158_v58  ;;  %v365_v46 = vrot.slane %v4070_v33, %v364_v43 }
 0x1ea   :  { %v2170_v63 = vpack.c.bf16 %v2166_v62, %v2162_v61  ;;  %v2167_v1 = vsel %vm2151_vm3, %v3227_v57, %v2159_v60 }
 0x1eb   :  { %v2171_v40 = vpack.c.bf16 %v2167_v1, %v2163_v0 }
 0x1ed   :  { %2602 = vmatprep.mubr.bf16.mxu0 %v2171_v40 }
 0x1ee   :  { %2603 = vmatmul.mubr.bf16.vlgmr.msra.gmra.mrb[4].mxu0 %v2170_v63 }
 0x1ef   :  { %2614 = vmatpush1.bf16.msra.mxu0 %v3718_v41 }
 0x1f0   :  { %2615 = vmatprep.subr.bf16.mxu0 %v3723_v2 }
 0x1f3   :  { %2616 = vmatpush1.bf16.msra.mxu0 %v3721_v4  ;;  %v3779_v4 = vld [vmem:[#allocation9 + $0x30] sm:$0xff]  }
 0x1f4   :  { %2617 = vmatprep.subr.bf16.mxu0 %v3726_v5  ;;  %3211 = vmatpush3.bf16.msra.mxu1 %v3779_v4  ;;  %v3780_v5 = vld [vmem:[#allocation9 + $0x78] sm:$0xff]  }
 0x1f5   :  { %3212 = vmatprep.subr.bf16.mxu1 %v3780_v5 }
 0x1f7   :  { %2618 = vmatpush1.bf16.msra.mxu0 %v3724_v7  ;;  %v2243_v7 = vrot.slane %v2238_v6, %v352_v32 }
 0x1f8   :  { %2619 = vmatprep.subr.bf16.mxu0 %v3729_v45  ;;  %3213 = vmatpush3.bf16.msra.mxu1 %v3781_v48  ;;  %v2247_v45 = vrot.slane %v2238_v6, %v356_v34 }
 0x1fb   :  { %2620 = vmatpush1.bf16.msra.mxu0 %v3727_v51 }
 0x1fc   :  { %2621 = vmatprep.subr.bf16.mxu0 %v3732_v9 }
 0x1ff   :  { %2622 = vmatpush1.bf16.msra.mxu0 %v3730_v12 }
 0x200   :  { %2623 = vmatprep.subr.bf16.mxu0 %v3735_v13 }
 0x203   :  { %2624 = vmatpush1.bf16.msra.mxu0 %v3733_v15 }
 0x204   :  { %2625 = vmatprep.subr.bf16.mxu0 %v3738_v16 }
 0x207   :  { %2626 = vmatpush1.bf16.msra.mxu0 %v3736_v17 }
 0x208   :  { %2627 = vmatprep.subr.bf16.mxu0 %v3741_v18 }
 0x20b   :  { %2628 = vmatpush1.bf16.msra.mxu0 %v3739_v19 }
 0x20c   :  { %2629 = vmatprep.subr.bf16.mxu0 %v3744_v20 }
 0x20f   :  { %2630 = vmatpush1.bf16.msra.mxu0 %v3742_v21 }
 0x210   :  { %2631 = vmatprep.subr.bf16.mxu0 %v3747_v22  ;;  %v2703_v22 = vstv %s4111_s6 }
 0x213   :  { %2632 = vmatpush1.bf16.msra.mxu0 %v3745_v23 }
 0x214   :  { %2633 = vmatprep.subr.bf16.mxu0 %v3750_v24 }
 0x217   :  { %2634 = vmatpush1.bf16.msra.mxu0 %v3748_v26 }
 0x218   :  { %2635 = vmatprep.subr.bf16.mxu0 %v3753_v27 }
 0x21b   :  { %2636 = vmatpush1.bf16.msra.mxu0 %v3751_v28 }
 0x21c   :  { %2637 = vmatprep.subr.bf16.mxu0 %v3756_v29 }
 0x21f   :  { %2638 = vmatpush1.bf16.msra.mxu0 %v3754_v30 }
 0x220   :  { %2639 = vmatprep.subr.bf16.mxu0 %v3759_v31 }
 0x223   :  { %2640 = vmatpush1.bf16.msra.mxu0 %v3757_v35 }
 0x224   :  { %2641 = vmatprep.subr.bf16.mxu0 %v3762_v36 }
 0x227   :  { %2642 = vmatpush1.bf16.msra.mxu0 %v3760_v37 }
 0x228   :  { %2643 = vmatprep.subr.bf16.mxu0 %v3765_v38 }
 0x22b   :  { %2644 = vmatpush1.bf16.msra.mxu0 %v3763_v49 }
 0x261   :  { %v2137_v50 = vpop.f32.mrb[4].mxu1 }
 0x262   :  { %v3228_v52 = vadd.f32 %v2137_v50, %v361_v44  ;;  %v2139_v53 = vpop.f32.mrb[5].mxu1 }
 0x263   :  { %v3229_v54 = vadd.f32 %v2139_v53, %v365_v46  ;;  %v2141_v55 = vpop.f32.mrb[6].mxu1 }
 0x264   :  { %v2156_v56 = vmul.f32 0.2, %v3228_v52  ;;  %v3230_v57 = vadd.f32 %v2141_v55, %v361_v44  ;;  %v2143_v58 = vpop.f32.mrb[7].mxu1  ;;  %vm2148_vm4 = vcmp.gt.f32.partialorder %v3228_v52, 0.0 }
 0x265   :  { %v2157_v60 = vmul.f32 0.2, %v3229_v54  ;;  %v3231_v61 = vadd.f32 %v2143_v58, %v365_v46  ;;  %vm2149_vm5 = vcmp.gt.f32.partialorder %v3229_v54, 0.0 }
 0x266   :  { %vm2152_vm6 = vcmp.gt.f32.partialorder %v3230_v57, 0.0  ;;  %v2160_v62 = vmul.f32 0.2, %v3230_v57  ;;  %v2164_v0 = vsel %vm2148_vm4, %v3228_v52, %v2156_v56 }
 0x267   :  { %vm2153_vm7 = vcmp.gt.f32.partialorder %v3231_v61, 0.0  ;;  %v2161_v63 = vmul.f32 0.2, %v3231_v61  ;;  %v2165_v33 = vsel %vm2149_vm5, %v3229_v54, %v2157_v60 }
 0x268   :  { %v2168_v1 = vsel %vm2152_vm6, %v3230_v57, %v2160_v62 }
 0x269   :  { %v2172_v40 = vpack.c.bf16 %v2168_v1, %v2164_v0  ;;  %v2169_v41 = vsel %vm2153_vm7, %v3231_v61, %v2161_v63 }
 0x26a   :  { %v2173_v2 = vpack.c.bf16 %v2169_v41, %v2165_v33 }
 0x26c   :  { %2645 = vmatprep.mubr.bf16.mxu0 %v2173_v2 }
 0x26d   :  { %2646 = vmatmul.mubr.bf16.vlgmr.msra.gmra.mrb[4].mxu0 %v2172_v40 }
 0x340   :  { %v2647_v8 = vpop.f32.mrb[4].mxu0 }
 0x341   :  { %v3232_v25 = vadd.f32 %v2647_v8, %v2243_v7  ;;  %v2649_v51 = vpop.f32.mrb[5].mxu0 }
 0x342   :  { %v3233_v9 = vadd.f32 %v2649_v51, %v2247_v45  ;;  %v2651_v10 = vpop.f32.mrb[6].mxu0 }
 0x343   :  { %v2660_v11 = vmul.f32 0.2, %v3232_v25  ;;  %v3234_v12 = vadd.f32 %v2651_v10, %v2243_v7  ;;  %v2653_v13 = vpop.f32.mrb[7].mxu0  ;;  %vm2656_vm8 = vcmp.gt.f32.partialorder %v3232_v25, 0.0 }
 0x344   :  { %v2661_v14 = vmul.f32 0.2, %v3233_v9  ;;  %v3235_v15 = vadd.f32 %v2653_v13, %v2247_v45  ;;  %vm2657_vm9 = vcmp.gt.f32.partialorder %v3233_v9, 0.0 }
 0x345   :  { %vm2658_vm10 = vcmp.gt.f32.partialorder %v3234_v12, 0.0  ;;  %v2662_v16 = vmul.f32 0.2, %v3234_v12  ;;  %v2664_v32 = vsel %vm2656_vm8, %v3232_v25, %v2660_v11 }
 0x346   :  { %vm2659_vm11 = vcmp.gt.f32.partialorder %v3235_v15, 0.0  ;;  %v2663_v17 = vmul.f32 0.2, %v3235_v15  ;;  %v2665_v34 = vsel %vm2657_vm9, %v3233_v9, %v2661_v14 }
 0x347   :  { %v2666_v18 = vsel %vm2658_vm10, %v3234_v12, %v2662_v16 }
 0x348   :  { %v2668_v47 = vpack.c.bf16 %v2666_v18, %v2664_v32  ;;  %v2667_v19 = vsel %vm2659_vm11, %v3235_v15, %v2663_v17 }
 0x349   :  { %v2669_v20 = vpack.c.bf16 %v2667_v19, %v2665_v34 }
 0x34b   :  { %2832 = vmatprep.mubr.bf16.mxu1 %v2669_v20 }
 0x34c   :  { %2833 = vmatmul.mubr.bf16.vlgmr.msra.gmra.mrb[8].mxu1 %v2668_v47 }
 0x41f   :  { %v3214_v21 = vpop.f32.mrb[8].mxu1 }
 0x420   :  { %v3215_v23 = vpop.f32.mrb[9].mxu1 }
 0x421   :  { %v3216_v24 = vadd.f32 %v3215_v23, %v3214_v21  ;;  %v3217_v26 = vpop.f32.mrb[10].mxu1 }
 0x422   :  { %v3218_v27 = vpop.f32.mrb[11].mxu1 }
 0x423   :  { %v2835_v28 = vadd.f32 %v3216_v24, %v2703_v22  ;;  %v3219_v29 = vadd.f32 %v3218_v27, %v3217_v26 }
 0x425   :  { %2841 = vst [vmem:[#allocation11] sm:$0xff] %v2835_v28  ;;  %v2838_v30 = vadd.f32 %v3219_v29, %v2703_v22 }
 0x427   :  { %2842 = vst [vmem:[#allocation11 + $0x8] sm:$0xff] %v2838_v30 }
 0x428   :  { %2847 = vsyncadd [#allocation5], 224  ;;  %s3911_s9 = smov [#allocation11]  }
 0x429   :  { %s2848_s10 = sshll.u32 %s3911_s9, 4  ;;  %s2849_s10 = int_to_ptr.vmem [resolvable:$true] %s2848_s10 }
 0x42a   :  { %s3870_s11 = scalar_lea.vmem %s2849_s10, 32  ;;  %s3874_s12 = scalar_lea.vmem %s2849_s10, 256 }
 0x42b   :  { %p3871_p4 = scmp.ne.s32.totalorder %s2849_s10, %s3870_s11  ;;  %p3875_p5 = scmp.lt.s32.totalorder %s2849_s10, %s2849_s10 }
 0x42c   :  { %p3876_p6 = scmp.lt.s32.totalorder %s3874_s12, %s3870_s11 }
 0x42e   :  { %p3877_p7 = por %p3876_p6, %p3875_p5 }
 0x430   :  { %p3878_p8 = pnand %p3877_p7, %p3871_p4 }
 0x432   :  { %3881 = shalt.err (!%p3878_p8)
}
 0x433   :  { %s3882_s14 = scalar_lea.hbm %s4112_s7, 32 }
 0x434   :  { %p3883_p9 = scmp.ne.s32.totalorder %s4112_s7, %s3882_s14  ;;  %p3886_p10 = scmp.lt.u32.totalorder %s3882_s14, %s4112_s7 }
 0x436   :  { %p3888_p11 = pnand %p3886_p10, %p3883_p9 }
 0x438   :  { %3891 = shalt.err (!%p3888_p11)
}
 0x439   :  { %s3912_s18 = smov 32   ;;  %s3913_s19 = smov 2  }
 0x43a   :  { %2854 = dma.vmem_to_hbm [thread:$0]  %s2849_s10, 32, %s4112_s7, [#allocation5], %s3912_s18, %s3912_s18, %s3913_s19  }
 0x43b   :  { %3898 = dma.done.wait [#allocation5], 256  }
 0x43c   :  { %3899 = vsyncadd [#allocation5], 4294967040 }
 0x43d   :  { %2858 = vsyncpa [#allocation4], 1 }
 0x43e   :  { %2859 = vsyncpa [#allocation7], 1 }
 0x43f   :  { %2860 = vsyncpa [#allocation10], 1 }
 0x440   :  { %2861 = vsyncpa [#allocation5], 1 }

</bundles_post_ra>
